<compile_context>
chip_gen: v6e
topology: v6e:2x2x1
jax: 0.10.0
libtpu: 0.0.40
codegen_flags: <defaults>
</compile_context>

<pallas_src>
import functools

import jax
import jax.numpy as jnp
from jax import lax
from jax.experimental import pallas as pl
from jax.experimental.pallas import tpu as pltpu


# ----------------------------------------------------------------------------
# Fused kernel: all GRU layers + last-batch-row selection + FC head.
# ----------------------------------------------------------------------------
def _make_fused_kernel(T, B, H, num_layers):
    def kernel(*refs):
        x_ref = refs[0]
        wfc_ref = refs[1 + 4 * num_layers]
        bfc_ref = refs[2 + 4 * num_layers]
        out_ref = refs[3 + 4 * num_layers]

        # Layer-0 input: (T*B, I), already flattened in the wrapper.
        cur = x_ref[...]
        last_rows = []

        for l in range(num_layers):
            wih_ref, whh_ref, bih_ref, bhh_ref = refs[1 + 4 * l: 5 + 4 * l]

            # Hoisted input projection for ALL timesteps at once:
            # gi_all[:, 0:H]=r, [H:2H]=z, [2H:3H]=n  (PyTorch gate order),
            # with b_ih already folded in.
            gi_all = (jnp.dot(cur, wih_ref[...],
                              preferred_element_type=jnp.float32)
                      + bih_ref[...])                      # (T*B, 3H)

            whh = whh_ref[...]                             # (H, 3H)
            bhh = bhh_ref[...]                             # (1, 3H)

            h = jnp.zeros((B, H), jnp.float32)
            hs = []
            for t in range(T):                             # fully unrolled
                gi = gi_all[t * B:(t + 1) * B, :]          # (B, 3H)
                # Single fused recurrent matmul per step.
                gh = (jnp.dot(h, whh, preferred_element_type=jnp.float32)
                      + bhh)                               # (B, 3H)
                r = jax.nn.sigmoid(gi[:, 0:H] + gh[:, 0:H])
                z = jax.nn.sigmoid(gi[:, H:2 * H] + gh[:, H:2 * H])
                n = jnp.tanh(gi[:, 2 * H:3 * H] + r * gh[:, 2 * H:3 * H])
                h = (1.0 - z) * n + z * h
                if l == num_layers - 1:
                    # Only the last batch row of the final layer is needed
                    # by the head (reference does out[:, -1, :]).
                    last_rows.append(h[B - 1:B, :])        # (1, H)
                else:
                    hs.append(h)

            if l < num_layers - 1:
                cur = jnp.concatenate(hs, axis=0)          # (T*B, H)

        last = jnp.concatenate(last_rows, axis=0)          # (T, H)

        # FC head on padded (lane-dense, 128-wide) weights -> unmasked store.
        out_ref[...] = (jnp.dot(last, wfc_ref[...],
                                preferred_element_type=jnp.float32)
                        + bfc_ref[...]).astype(out_ref.dtype)

    return kernel


def gru_model_pallas(x, params):
    """x: (T, B, I) f32; params as produced by init_params. Returns (T, C)."""
    T, B, I = x.shape
    num_layers = len(params["gru"])
    H = params["gru"][0]["w_hh"].shape[1]
    C = params["fc"]["w"].shape[0]
    C_pad = ((C + 127) // 128) * 128                       # lane-dense output

    x_flat = x.reshape(T * B, I).astype(jnp.float32)

    inputs = [x_flat]
    in_specs = [pl.BlockSpec((T * B, I), lambda: (0, 0))]

    flops = 0
    transcendentals = 0
    in_sz = I
    for lp in params["gru"]:
        # Fused + pre-transposed gate weights: columns ordered [r | z | n].
        wih_f = lp["w_ih"].T                               # (in_sz, 3H)
        whh_f = lp["w_hh"].T                               # (H, 3H)
        bih_f = lp["b_ih"].reshape(1, 3 * H)
        bhh_f = lp["b_hh"].reshape(1, 3 * H)
        inputs += [wih_f, whh_f, bih_f, bhh_f]
        in_specs += [
            pl.BlockSpec((in_sz, 3 * H), lambda: (0, 0)),
            pl.BlockSpec((H, 3 * H), lambda: (0, 0)),
            pl.BlockSpec((1, 3 * H), lambda: (0, 0)),
            pl.BlockSpec((1, 3 * H), lambda: (0, 0)),
        ]
        flops += 2 * T * B * in_sz * 3 * H                 # hoisted input proj
        flops += 2 * T * B * H * 3 * H                     # recurrent matmuls
        flops += 12 * T * B * H                            # gate elementwise
        transcendentals += 3 * T * B * H                   # 2x sigmoid + tanh
        in_sz = H

    # Zero-padded FC head (H, C_pad) / (1, C_pad).
    wfc = jnp.zeros((H, C_pad), jnp.float32).at[:, :C].set(params["fc"]["w"].T)
    bfc = jnp.zeros((1, C_pad), jnp.float32).at[:, :C].set(
        params["fc"]["b"].reshape(1, C))
    inputs += [wfc, bfc]
    in_specs += [
        pl.BlockSpec((H, C_pad), lambda: (0, 0)),
        pl.BlockSpec((1, C_pad), lambda: (0, 0)),
    ]
    flops += 2 * T * H * C_pad

    bytes_accessed = int(sum(int(a.size) for a in inputs) * 4 + T * C_pad * 4)

    out_pad = pl.pallas_call(
        _make_fused_kernel(T, B, H, num_layers),
        out_shape=jax.ShapeDtypeStruct((T, C_pad), jnp.float32),
        in_specs=in_specs,
        out_specs=pl.BlockSpec((T, C_pad), lambda: (0, 0)),
        cost_estimate=pl.CostEstimate(
            flops=int(flops),
            transcendentals=int(transcendentals),
            bytes_accessed=bytes_accessed,
        ),
    )(*inputs)

    return out_pad[:, :C]


# ----------------------------------------------------------------------------
# Parameter init (PyTorch-style uniform)
# ----------------------------------------------------------------------------
def init_params(key, num_classes, input_size, hidden_size, num_layers):
    params = {"gru": [], "fc": None}
    k = 1.0 / jnp.sqrt(hidden_size)
    for layer in range(num_layers):
        in_sz = input_size if layer == 0 else hidden_size
        key, k1, k2, k3, k4 = jax.random.split(key, 5)
        params["gru"].append({
            "w_ih": jax.random.uniform(k1, (3 * hidden_size, in_sz), jnp.float32, -k, k),
            "w_hh": jax.random.uniform(k2, (3 * hidden_size, hidden_size), jnp.float32, -k, k),
            "b_ih": jax.random.uniform(k3, (3 * hidden_size,), jnp.float32, -k, k),
            "b_hh": jax.random.uniform(k4, (3 * hidden_size,), jnp.float32, -k, k),
        })
    key, k1, k2 = jax.random.split(key, 3)
    params["fc"] = {
        "w": jax.random.uniform(k1, (num_classes, hidden_size), jnp.float32, -k, k),
        "b": jax.random.uniform(k2, (num_classes,), jnp.float32, -k, k),
    }
    return params


@jax.jit
def gru_model_forward(x, params):
    return gru_model_pallas(x, params)


# ----------------------------------------------------------------------------
# Pure-JAX reference (lax.scan) for correctness check
# ----------------------------------------------------------------------------
def gru_layer_ref(x, w_ih, w_hh, b_ih, b_hh):
    T, B, _ = x.shape
    H = w_hh.shape[1]

    def step(h, x_t):
        gi = x_t @ w_ih.T + b_ih
        gh = h @ w_hh.T + b_hh
        r = jax.nn.sigmoid(gi[:, :H] + gh[:, :H])
        z = jax.nn.sigmoid(gi[:, H:2 * H] + gh[:, H:2 * H])
        n = jnp.tanh(gi[:, 2 * H:] + r * gh[:, 2 * H:])
        h_new = (1 - z) * n + z * h
        return h_new, h_new

    h0 = jnp.zeros((B, H), jnp.float32)
    _, outs = lax.scan(step, h0, x)
    return outs


def gru_model_ref(x, params):
    h = x
    for layer_p in params["gru"]:
        h = gru_layer_ref(h, layer_p["w_ih"], layer_p["w_hh"],
                          layer_p["b_ih"], layer_p["b_hh"])
    last = h[:, -1, :]
    return last @ params["fc"]["w"].T + params["fc"]["b"]


if __name__ == "__main__":
    num_classes = 5
    input_size = 4
    hidden_size = 32
    num_layers = 2
    seq_length = 8
    batch = 8          # must equal seq_length for the reference forward to run

    key = jax.random.PRNGKey(0)
    kx, kp = jax.random.split(key)
    x = jax.random.normal(kx, (seq_length, batch, input_size), jnp.float32)
    params = init_params(kp, num_classes, input_size, hidden_size, num_layers)

    out = gru_model_forward(x, params)
    out = jax.block_until_ready(out)

    ref = gru_model_ref(x, params)
    assert out.shape == (seq_length, num_classes), out.shape
    max_err = jnp.max(jnp.abs(out - ref))
    assert jnp.allclose(out, ref, atol=1e-4, rtol=1e-4), f"max err {max_err}"

    print("KERNEL_OK")
</pallas_src>

<mosaic_0001>
module attributes {stable_mosaic.version = 11 : i64} {
  func.func @kernel(%arg0: memref<64x4xf32, #tpu.memory_space<vmem>>, %arg1: memref<4x96xf32, #tpu.memory_space<vmem>>, %arg2: memref<32x96xf32, #tpu.memory_space<vmem>>, %arg3: memref<1x96xf32, #tpu.memory_space<vmem>>, %arg4: memref<1x96xf32, #tpu.memory_space<vmem>>, %arg5: memref<32x96xf32, #tpu.memory_space<vmem>>, %arg6: memref<32x96xf32, #tpu.memory_space<vmem>>, %arg7: memref<1x96xf32, #tpu.memory_space<vmem>>, %arg8: memref<1x96xf32, #tpu.memory_space<vmem>>, %arg9: memref<32x128xf32, #tpu.memory_space<vmem>>, %arg10: memref<1x128xf32, #tpu.memory_space<vmem>>, %arg11: memref<8x128xf32, #tpu.memory_space<vmem>>) attributes {dimension_semantics = [], scalar_prefetch = 0 : i64, scratch_operands = 0 : i64, tpu.core_type = #tpu.core_type<tc>} {
    %c0 = arith.constant 0 : index
    %c0_0 = arith.constant 0 : index
    %0 = vector.load %arg0[%c0, %c0_0] : memref<64x4xf32, #tpu.memory_space<vmem>>, vector<64x4xf32>
    %c0_1 = arith.constant 0 : index
    %c0_2 = arith.constant 0 : index
    %1 = vector.load %arg1[%c0_1, %c0_2] : memref<4x96xf32, #tpu.memory_space<vmem>>, vector<4x96xf32>
    %cst = arith.constant dense<0.000000e+00> : vector<64x96xf32>
    %2 = tpu.matmul %0, %1, %cst {dimension_numbers = #tpu.dot_dimension_numbers<[1], [0], [0], [1], [0, 0, 1, 1], [], []>} : vector<64x4xf32>, vector<4x96xf32>, vector<64x96xf32> -> vector<64x96xf32>
    %c0_3 = arith.constant 0 : index
    %c0_4 = arith.constant 0 : index
    %3 = vector.load %arg3[%c0_3, %c0_4] : memref<1x96xf32, #tpu.memory_space<vmem>>, vector<1x96xf32>
    %4 = vector.broadcast %3 : vector<1x96xf32> to vector<64x96xf32>
    %5 = arith.addf %2, %4 : vector<64x96xf32>
    %c0_5 = arith.constant 0 : index
    %c0_6 = arith.constant 0 : index
    %6 = vector.load %arg2[%c0_5, %c0_6] : memref<32x96xf32, #tpu.memory_space<vmem>>, vector<32x96xf32>
    %c0_7 = arith.constant 0 : index
    %c0_8 = arith.constant 0 : index
    %7 = vector.load %arg4[%c0_7, %c0_8] : memref<1x96xf32, #tpu.memory_space<vmem>>, vector<1x96xf32>
    %cst_9 = arith.constant 0.000000e+00 : f32
    %8 = vector.broadcast %cst_9 : f32 to vector<8x32xf32>
    %9 = vector.extract_strided_slice %5 {offsets = [0, 0], sizes = [8, 96], strides = [1, 1]} : vector<64x96xf32> to vector<8x96xf32>
    %cst_10 = arith.constant dense<0.000000e+00> : vector<8x96xf32>
    %10 = tpu.matmul %8, %6, %cst_10 {dimension_numbers = #tpu.dot_dimension_numbers<[1], [0], [0], [1], [0, 0, 1, 1], [], []>} : vector<8x32xf32>, vector<32x96xf32>, vector<8x96xf32> -> vector<8x96xf32>
    %11 = vector.broadcast %7 : vector<1x96xf32> to vector<8x96xf32>
    %12 = arith.addf %10, %11 : vector<8x96xf32>
    %13 = vector.extract_strided_slice %9 {offsets = [0, 0], sizes = [8, 32], strides = [1, 1]} : vector<8x96xf32> to vector<8x32xf32>
    %14 = vector.extract_strided_slice %12 {offsets = [0, 0], sizes = [8, 32], strides = [1, 1]} : vector<8x96xf32> to vector<8x32xf32>
    %15 = arith.addf %13, %14 : vector<8x32xf32>
    %16 = arith.negf %15 : vector<8x32xf32>
    %17 = math.exp %16 : vector<8x32xf32>
    %cst_11 = arith.constant 1.000000e+00 : f32
    %18 = vector.broadcast %cst_11 : f32 to vector<8x32xf32>
    %19 = arith.addf %18, %17 : vector<8x32xf32>
    %20 = arith.divf %18, %19 : vector<8x32xf32>
    %21 = vector.extract_strided_slice %9 {offsets = [0, 32], sizes = [8, 32], strides = [1, 1]} : vector<8x96xf32> to vector<8x32xf32>
    %22 = vector.extract_strided_slice %12 {offsets = [0, 32], sizes = [8, 32], strides = [1, 1]} : vector<8x96xf32> to vector<8x32xf32>
    %23 = arith.addf %21, %22 : vector<8x32xf32>
    %24 = arith.negf %23 : vector<8x32xf32>
    %25 = math.exp %24 : vector<8x32xf32>
    %cst_12 = arith.constant 1.000000e+00 : f32
    %26 = vector.broadcast %cst_12 : f32 to vector<8x32xf32>
    %27 = arith.addf %26, %25 : vector<8x32xf32>
    %28 = arith.divf %26, %27 : vector<8x32xf32>
    %29 = vector.extract_strided_slice %9 {offsets = [0, 64], sizes = [8, 32], strides = [1, 1]} : vector<8x96xf32> to vector<8x32xf32>
    %30 = vector.extract_strided_slice %12 {offsets = [0, 64], sizes = [8, 32], strides = [1, 1]} : vector<8x96xf32> to vector<8x32xf32>
    %31 = arith.mulf %20, %30 : vector<8x32xf32>
    %32 = arith.addf %29, %31 : vector<8x32xf32>
    %33 = math.tanh %32 : vector<8x32xf32>
    %cst_13 = arith.constant 1.000000e+00 : f32
    %34 = vector.broadcast %cst_13 : f32 to vector<8x32xf32>
    %35 = arith.subf %34, %28 : vector<8x32xf32>
    %36 = arith.mulf %35, %33 : vector<8x32xf32>
    %37 = arith.mulf %28, %8 : vector<8x32xf32>
    %38 = arith.addf %36, %37 : vector<8x32xf32>
    %39 = vector.extract_strided_slice %5 {offsets = [8, 0], sizes = [8, 96], strides = [1, 1]} : vector<64x96xf32> to vector<8x96xf32>
    %cst_14 = arith.constant dense<0.000000e+00> : vector<8x96xf32>
    %40 = tpu.matmul %38, %6, %cst_14 {dimension_numbers = #tpu.dot_dimension_numbers<[1], [0], [0], [1], [0, 0, 1, 1], [], []>} : vector<8x32xf32>, vector<32x96xf32>, vector<8x96xf32> -> vector<8x96xf32>
    %41 = vector.broadcast %7 : vector<1x96xf32> to vector<8x96xf32>
    %42 = arith.addf %40, %41 : vector<8x96xf32>
    %43 = vector.extract_strided_slice %39 {offsets = [0, 0], sizes = [8, 32], strides = [1, 1]} : vector<8x96xf32> to vector<8x32xf32>
    %44 = vector.extract_strided_slice %42 {offsets = [0, 0], sizes = [8, 32], strides = [1, 1]} : vector<8x96xf32> to vector<8x32xf32>
    %45 = arith.addf %43, %44 : vector<8x32xf32>
    %46 = arith.negf %45 : vector<8x32xf32>
    %47 = math.exp %46 : vector<8x32xf32>
    %cst_15 = arith.constant 1.000000e+00 : f32
    %48 = vector.broadcast %cst_15 : f32 to vector<8x32xf32>
    %49 = arith.addf %48, %47 : vector<8x32xf32>
    %50 = arith.divf %48, %49 : vector<8x32xf32>
    %51 = vector.extract_strided_slice %39 {offsets = [0, 32], sizes = [8, 32], strides = [1, 1]} : vector<8x96xf32> to vector<8x32xf32>
    %52 = vector.extract_strided_slice %42 {offsets = [0, 32], sizes = [8, 32], strides = [1, 1]} : vector<8x96xf32> to vector<8x32xf32>
    %53 = arith.addf %51, %52 : vector<8x32xf32>
    %54 = arith.negf %53 : vector<8x32xf32>
    %55 = math.exp %54 : vector<8x32xf32>
    %cst_16 = arith.constant 1.000000e+00 : f32
    %56 = vector.broadcast %cst_16 : f32 to vector<8x32xf32>
    %57 = arith.addf %56, %55 : vector<8x32xf32>
    %58 = arith.divf %56, %57 : vector<8x32xf32>
    %59 = vector.extract_strided_slice %39 {offsets = [0, 64], sizes = [8, 32], strides = [1, 1]} : vector<8x96xf32> to vector<8x32xf32>
    %60 = vector.extract_strided_slice %42 {offsets = [0, 64], sizes = [8, 32], strides = [1, 1]} : vector<8x96xf32> to vector<8x32xf32>
    %61 = arith.mulf %50, %60 : vector<8x32xf32>
    %62 = arith.addf %59, %61 : vector<8x32xf32>
    %63 = math.tanh %62 : vector<8x32xf32>
    %cst_17 = arith.constant 1.000000e+00 : f32
    %64 = vector.broadcast %cst_17 : f32 to vector<8x32xf32>
    %65 = arith.subf %64, %58 : vector<8x32xf32>
    %66 = arith.mulf %65, %63 : vector<8x32xf32>
    %67 = arith.mulf %58, %38 : vector<8x32xf32>
    %68 = arith.addf %66, %67 : vector<8x32xf32>
    %69 = vector.extract_strided_slice %5 {offsets = [16, 0], sizes = [8, 96], strides = [1, 1]} : vector<64x96xf32> to vector<8x96xf32>
    %cst_18 = arith.constant dense<0.000000e+00> : vector<8x96xf32>
    %70 = tpu.matmul %68, %6, %cst_18 {dimension_numbers = #tpu.dot_dimension_numbers<[1], [0], [0], [1], [0, 0, 1, 1], [], []>} : vector<8x32xf32>, vector<32x96xf32>, vector<8x96xf32> -> vector<8x96xf32>
    %71 = vector.broadcast %7 : vector<1x96xf32> to vector<8x96xf32>
    %72 = arith.addf %70, %71 : vector<8x96xf32>
    %73 = vector.extract_strided_slice %69 {offsets = [0, 0], sizes = [8, 32], strides = [1, 1]} : vector<8x96xf32> to vector<8x32xf32>
    %74 = vector.extract_strided_slice %72 {offsets = [0, 0], sizes = [8, 32], strides = [1, 1]} : vector<8x96xf32> to vector<8x32xf32>
    %75 = arith.addf %73, %74 : vector<8x32xf32>
    %76 = arith.negf %75 : vector<8x32xf32>
    %77 = math.exp %76 : vector<8x32xf32>
    %cst_19 = arith.constant 1.000000e+00 : f32
    %78 = vector.broadcast %cst_19 : f32 to vector<8x32xf32>
    %79 = arith.addf %78, %77 : vector<8x32xf32>
    %80 = arith.divf %78, %79 : vector<8x32xf32>
    %81 = vector.extract_strided_slice %69 {offsets = [0, 32], sizes = [8, 32], strides = [1, 1]} : vector<8x96xf32> to vector<8x32xf32>
    %82 = vector.extract_strided_slice %72 {offsets = [0, 32], sizes = [8, 32], strides = [1, 1]} : vector<8x96xf32> to vector<8x32xf32>
    %83 = arith.addf %81, %82 : vector<8x32xf32>
    %84 = arith.negf %83 : vector<8x32xf32>
    %85 = math.exp %84 : vector<8x32xf32>
    %cst_20 = arith.constant 1.000000e+00 : f32
    %86 = vector.broadcast %cst_20 : f32 to vector<8x32xf32>
    %87 = arith.addf %86, %85 : vector<8x32xf32>
    %88 = arith.divf %86, %87 : vector<8x32xf32>
    %89 = vector.extract_strided_slice %69 {offsets = [0, 64], sizes = [8, 32], strides = [1, 1]} : vector<8x96xf32> to vector<8x32xf32>
    %90 = vector.extract_strided_slice %72 {offsets = [0, 64], sizes = [8, 32], strides = [1, 1]} : vector<8x96xf32> to vector<8x32xf32>
    %91 = arith.mulf %80, %90 : vector<8x32xf32>
    %92 = arith.addf %89, %91 : vector<8x32xf32>
    %93 = math.tanh %92 : vector<8x32xf32>
    %cst_21 = arith.constant 1.000000e+00 : f32
    %94 = vector.broadcast %cst_21 : f32 to vector<8x32xf32>
    %95 = arith.subf %94, %88 : vector<8x32xf32>
    %96 = arith.mulf %95, %93 : vector<8x32xf32>
    %97 = arith.mulf %88, %68 : vector<8x32xf32>
    %98 = arith.addf %96, %97 : vector<8x32xf32>
    %99 = vector.extract_strided_slice %5 {offsets = [24, 0], sizes = [8, 96], strides = [1, 1]} : vector<64x96xf32> to vector<8x96xf32>
    %cst_22 = arith.constant dense<0.000000e+00> : vector<8x96xf32>
    %100 = tpu.matmul %98, %6, %cst_22 {dimension_numbers = #tpu.dot_dimension_numbers<[1], [0], [0], [1], [0, 0, 1, 1], [], []>} : vector<8x32xf32>, vector<32x96xf32>, vector<8x96xf32> -> vector<8x96xf32>
    %101 = vector.broadcast %7 : vector<1x96xf32> to vector<8x96xf32>
    %102 = arith.addf %100, %101 : vector<8x96xf32>
    %103 = vector.extract_strided_slice %99 {offsets = [0, 0], sizes = [8, 32], strides = [1, 1]} : vector<8x96xf32> to vector<8x32xf32>
    %104 = vector.extract_strided_slice %102 {offsets = [0, 0], sizes = [8, 32], strides = [1, 1]} : vector<8x96xf32> to vector<8x32xf32>
    %105 = arith.addf %103, %104 : vector<8x32xf32>
    %106 = arith.negf %105 : vector<8x32xf32>
    %107 = math.exp %106 : vector<8x32xf32>
    %cst_23 = arith.constant 1.000000e+00 : f32
    %108 = vector.broadcast %cst_23 : f32 to vector<8x32xf32>
    %109 = arith.addf %108, %107 : vector<8x32xf32>
    %110 = arith.divf %108, %109 : vector<8x32xf32>
    %111 = vector.extract_strided_slice %99 {offsets = [0, 32], sizes = [8, 32], strides = [1, 1]} : vector<8x96xf32> to vector<8x32xf32>
    %112 = vector.extract_strided_slice %102 {offsets = [0, 32], sizes = [8, 32], strides = [1, 1]} : vector<8x96xf32> to vector<8x32xf32>
    %113 = arith.addf %111, %112 : vector<8x32xf32>
    %114 = arith.negf %113 : vector<8x32xf32>
    %115 = math.exp %114 : vector<8x32xf32>
    %cst_24 = arith.constant 1.000000e+00 : f32
    %116 = vector.broadcast %cst_24 : f32 to vector<8x32xf32>
    %117 = arith.addf %116, %115 : vector<8x32xf32>
    %118 = arith.divf %116, %117 : vector<8x32xf32>
    %119 = vector.extract_strided_slice %99 {offsets = [0, 64], sizes = [8, 32], strides = [1, 1]} : vector<8x96xf32> to vector<8x32xf32>
    %120 = vector.extract_strided_slice %102 {offsets = [0, 64], sizes = [8, 32], strides = [1, 1]} : vector<8x96xf32> to vector<8x32xf32>
    %121 = arith.mulf %110, %120 : vector<8x32xf32>
    %122 = arith.addf %119, %121 : vector<8x32xf32>
    %123 = math.tanh %122 : vector<8x32xf32>
    %cst_25 = arith.constant 1.000000e+00 : f32
    %124 = vector.broadcast %cst_25 : f32 to vector<8x32xf32>
    %125 = arith.subf %124, %118 : vector<8x32xf32>
    %126 = arith.mulf %125, %123 : vector<8x32xf32>
    %127 = arith.mulf %118, %98 : vector<8x32xf32>
    %128 = arith.addf %126, %127 : vector<8x32xf32>
    %129 = vector.extract_strided_slice %5 {offsets = [32, 0], sizes = [8, 96], strides = [1, 1]} : vector<64x96xf32> to vector<8x96xf32>
    %cst_26 = arith.constant dense<0.000000e+00> : vector<8x96xf32>
    %130 = tpu.matmul %128, %6, %cst_26 {dimension_numbers = #tpu.dot_dimension_numbers<[1], [0], [0], [1], [0, 0, 1, 1], [], []>} : vector<8x32xf32>, vector<32x96xf32>, vector<8x96xf32> -> vector<8x96xf32>
    %131 = vector.broadcast %7 : vector<1x96xf32> to vector<8x96xf32>
    %132 = arith.addf %130, %131 : vector<8x96xf32>
    %133 = vector.extract_strided_slice %129 {offsets = [0, 0], sizes = [8, 32], strides = [1, 1]} : vector<8x96xf32> to vector<8x32xf32>
    %134 = vector.extract_strided_slice %132 {offsets = [0, 0], sizes = [8, 32], strides = [1, 1]} : vector<8x96xf32> to vector<8x32xf32>
    %135 = arith.addf %133, %134 : vector<8x32xf32>
    %136 = arith.negf %135 : vector<8x32xf32>
    %137 = math.exp %136 : vector<8x32xf32>
    %cst_27 = arith.constant 1.000000e+00 : f32
    %138 = vector.broadcast %cst_27 : f32 to vector<8x32xf32>
    %139 = arith.addf %138, %137 : vector<8x32xf32>
    %140 = arith.divf %138, %139 : vector<8x32xf32>
    %141 = vector.extract_strided_slice %129 {offsets = [0, 32], sizes = [8, 32], strides = [1, 1]} : vector<8x96xf32> to vector<8x32xf32>
    %142 = vector.extract_strided_slice %132 {offsets = [0, 32], sizes = [8, 32], strides = [1, 1]} : vector<8x96xf32> to vector<8x32xf32>
    %143 = arith.addf %141, %142 : vector<8x32xf32>
    %144 = arith.negf %143 : vector<8x32xf32>
    %145 = math.exp %144 : vector<8x32xf32>
    %cst_28 = arith.constant 1.000000e+00 : f32
    %146 = vector.broadcast %cst_28 : f32 to vector<8x32xf32>
    %147 = arith.addf %146, %145 : vector<8x32xf32>
    %148 = arith.divf %146, %147 : vector<8x32xf32>
    %149 = vector.extract_strided_slice %129 {offsets = [0, 64], sizes = [8, 32], strides = [1, 1]} : vector<8x96xf32> to vector<8x32xf32>
    %150 = vector.extract_strided_slice %132 {offsets = [0, 64], sizes = [8, 32], strides = [1, 1]} : vector<8x96xf32> to vector<8x32xf32>
    %151 = arith.mulf %140, %150 : vector<8x32xf32>
    %152 = arith.addf %149, %151 : vector<8x32xf32>
    %153 = math.tanh %152 : vector<8x32xf32>
    %cst_29 = arith.constant 1.000000e+00 : f32
    %154 = vector.broadcast %cst_29 : f32 to vector<8x32xf32>
    %155 = arith.subf %154, %148 : vector<8x32xf32>
    %156 = arith.mulf %155, %153 : vector<8x32xf32>
    %157 = arith.mulf %148, %128 : vector<8x32xf32>
    %158 = arith.addf %156, %157 : vector<8x32xf32>
    %159 = vector.extract_strided_slice %5 {offsets = [40, 0], sizes = [8, 96], strides = [1, 1]} : vector<64x96xf32> to vector<8x96xf32>
    %cst_30 = arith.constant dense<0.000000e+00> : vector<8x96xf32>
    %160 = tpu.matmul %158, %6, %cst_30 {dimension_numbers = #tpu.dot_dimension_numbers<[1], [0], [0], [1], [0, 0, 1, 1], [], []>} : vector<8x32xf32>, vector<32x96xf32>, vector<8x96xf32> -> vector<8x96xf32>
    %161 = vector.broadcast %7 : vector<1x96xf32> to vector<8x96xf32>
    %162 = arith.addf %160, %161 : vector<8x96xf32>
    %163 = vector.extract_strided_slice %159 {offsets = [0, 0], sizes = [8, 32], strides = [1, 1]} : vector<8x96xf32> to vector<8x32xf32>
    %164 = vector.extract_strided_slice %162 {offsets = [0, 0], sizes = [8, 32], strides = [1, 1]} : vector<8x96xf32> to vector<8x32xf32>
    %165 = arith.addf %163, %164 : vector<8x32xf32>
    %166 = arith.negf %165 : vector<8x32xf32>
    %167 = math.exp %166 : vector<8x32xf32>
    %cst_31 = arith.constant 1.000000e+00 : f32
    %168 = vector.broadcast %cst_31 : f32 to vector<8x32xf32>
    %169 = arith.addf %168, %167 : vector<8x32xf32>
    %170 = arith.divf %168, %169 : vector<8x32xf32>
    %171 = vector.extract_strided_slice %159 {offsets = [0, 32], sizes = [8, 32], strides = [1, 1]} : vector<8x96xf32> to vector<8x32xf32>
    %172 = vector.extract_strided_slice %162 {offsets = [0, 32], sizes = [8, 32], strides = [1, 1]} : vector<8x96xf32> to vector<8x32xf32>
    %173 = arith.addf %171, %172 : vector<8x32xf32>
    %174 = arith.negf %173 : vector<8x32xf32>
    %175 = math.exp %174 : vector<8x32xf32>
    %cst_32 = arith.constant 1.000000e+00 : f32
    %176 = vector.broadcast %cst_32 : f32 to vector<8x32xf32>
    %177 = arith.addf %176, %175 : vector<8x32xf32>
    %178 = arith.divf %176, %177 : vector<8x32xf32>
    %179 = vector.extract_strided_slice %159 {offsets = [0, 64], sizes = [8, 32], strides = [1, 1]} : vector<8x96xf32> to vector<8x32xf32>
    %180 = vector.extract_strided_slice %162 {offsets = [0, 64], sizes = [8, 32], strides = [1, 1]} : vector<8x96xf32> to vector<8x32xf32>
    %181 = arith.mulf %170, %180 : vector<8x32xf32>
    %182 = arith.addf %179, %181 : vector<8x32xf32>
    %183 = math.tanh %182 : vector<8x32xf32>
    %cst_33 = arith.constant 1.000000e+00 : f32
    %184 = vector.broadcast %cst_33 : f32 to vector<8x32xf32>
    %185 = arith.subf %184, %178 : vector<8x32xf32>
    %186 = arith.mulf %185, %183 : vector<8x32xf32>
    %187 = arith.mulf %178, %158 : vector<8x32xf32>
    %188 = arith.addf %186, %187 : vector<8x32xf32>
    %189 = vector.extract_strided_slice %5 {offsets = [48, 0], sizes = [8, 96], strides = [1, 1]} : vector<64x96xf32> to vector<8x96xf32>
    %cst_34 = arith.constant dense<0.000000e+00> : vector<8x96xf32>
    %190 = tpu.matmul %188, %6, %cst_34 {dimension_numbers = #tpu.dot_dimension_numbers<[1], [0], [0], [1], [0, 0, 1, 1], [], []>} : vector<8x32xf32>, vector<32x96xf32>, vector<8x96xf32> -> vector<8x96xf32>
    %191 = vector.broadcast %7 : vector<1x96xf32> to vector<8x96xf32>
    %192 = arith.addf %190, %191 : vector<8x96xf32>
    %193 = vector.extract_strided_slice %189 {offsets = [0, 0], sizes = [8, 32], strides = [1, 1]} : vector<8x96xf32> to vector<8x32xf32>
    %194 = vector.extract_strided_slice %192 {offsets = [0, 0], sizes = [8, 32], strides = [1, 1]} : vector<8x96xf32> to vector<8x32xf32>
    %195 = arith.addf %193, %194 : vector<8x32xf32>
    %196 = arith.negf %195 : vector<8x32xf32>
    %197 = math.exp %196 : vector<8x32xf32>
    %cst_35 = arith.constant 1.000000e+00 : f32
    %198 = vector.broadcast %cst_35 : f32 to vector<8x32xf32>
    %199 = arith.addf %198, %197 : vector<8x32xf32>
    %200 = arith.divf %198, %199 : vector<8x32xf32>
    %201 = vector.extract_strided_slice %189 {offsets = [0, 32], sizes = [8, 32], strides = [1, 1]} : vector<8x96xf32> to vector<8x32xf32>
    %202 = vector.extract_strided_slice %192 {offsets = [0, 32], sizes = [8, 32], strides = [1, 1]} : vector<8x96xf32> to vector<8x32xf32>
    %203 = arith.addf %201, %202 : vector<8x32xf32>
    %204 = arith.negf %203 : vector<8x32xf32>
    %205 = math.exp %204 : vector<8x32xf32>
    %cst_36 = arith.constant 1.000000e+00 : f32
    %206 = vector.broadcast %cst_36 : f32 to vector<8x32xf32>
    %207 = arith.addf %206, %205 : vector<8x32xf32>
    %208 = arith.divf %206, %207 : vector<8x32xf32>
    %209 = vector.extract_strided_slice %189 {offsets = [0, 64], sizes = [8, 32], strides = [1, 1]} : vector<8x96xf32> to vector<8x32xf32>
    %210 = vector.extract_strided_slice %192 {offsets = [0, 64], sizes = [8, 32], strides = [1, 1]} : vector<8x96xf32> to vector<8x32xf32>
    %211 = arith.mulf %200, %210 : vector<8x32xf32>
    %212 = arith.addf %209, %211 : vector<8x32xf32>
    %213 = math.tanh %212 : vector<8x32xf32>
    %cst_37 = arith.constant 1.000000e+00 : f32
    %214 = vector.broadcast %cst_37 : f32 to vector<8x32xf32>
    %215 = arith.subf %214, %208 : vector<8x32xf32>
    %216 = arith.mulf %215, %213 : vector<8x32xf32>
    %217 = arith.mulf %208, %188 : vector<8x32xf32>
    %218 = arith.addf %216, %217 : vector<8x32xf32>
    %219 = vector.extract_strided_slice %5 {offsets = [56, 0], sizes = [8, 96], strides = [1, 1]} : vector<64x96xf32> to vector<8x96xf32>
    %cst_38 = arith.constant dense<0.000000e+00> : vector<8x96xf32>
    %220 = tpu.matmul %218, %6, %cst_38 {dimension_numbers = #tpu.dot_dimension_numbers<[1], [0], [0], [1], [0, 0, 1, 1], [], []>} : vector<8x32xf32>, vector<32x96xf32>, vector<8x96xf32> -> vector<8x96xf32>
    %221 = vector.broadcast %7 : vector<1x96xf32> to vector<8x96xf32>
    %222 = arith.addf %220, %221 : vector<8x96xf32>
    %223 = vector.extract_strided_slice %219 {offsets = [0, 0], sizes = [8, 32], strides = [1, 1]} : vector<8x96xf32> to vector<8x32xf32>
    %224 = vector.extract_strided_slice %222 {offsets = [0, 0], sizes = [8, 32], strides = [1, 1]} : vector<8x96xf32> to vector<8x32xf32>
    %225 = arith.addf %223, %224 : vector<8x32xf32>
    %226 = arith.negf %225 : vector<8x32xf32>
    %227 = math.exp %226 : vector<8x32xf32>
    %cst_39 = arith.constant 1.000000e+00 : f32
    %228 = vector.broadcast %cst_39 : f32 to vector<8x32xf32>
    %229 = arith.addf %228, %227 : vector<8x32xf32>
    %230 = arith.divf %228, %229 : vector<8x32xf32>
    %231 = vector.extract_strided_slice %219 {offsets = [0, 32], sizes = [8, 32], strides = [1, 1]} : vector<8x96xf32> to vector<8x32xf32>
    %232 = vector.extract_strided_slice %222 {offsets = [0, 32], sizes = [8, 32], strides = [1, 1]} : vector<8x96xf32> to vector<8x32xf32>
    %233 = arith.addf %231, %232 : vector<8x32xf32>
    %234 = arith.negf %233 : vector<8x32xf32>
    %235 = math.exp %234 : vector<8x32xf32>
    %cst_40 = arith.constant 1.000000e+00 : f32
    %236 = vector.broadcast %cst_40 : f32 to vector<8x32xf32>
    %237 = arith.addf %236, %235 : vector<8x32xf32>
    %238 = arith.divf %236, %237 : vector<8x32xf32>
    %239 = vector.extract_strided_slice %219 {offsets = [0, 64], sizes = [8, 32], strides = [1, 1]} : vector<8x96xf32> to vector<8x32xf32>
    %240 = vector.extract_strided_slice %222 {offsets = [0, 64], sizes = [8, 32], strides = [1, 1]} : vector<8x96xf32> to vector<8x32xf32>
    %241 = arith.mulf %230, %240 : vector<8x32xf32>
    %242 = arith.addf %239, %241 : vector<8x32xf32>
    %243 = math.tanh %242 : vector<8x32xf32>
    %cst_41 = arith.constant 1.000000e+00 : f32
    %244 = vector.broadcast %cst_41 : f32 to vector<8x32xf32>
    %245 = arith.subf %244, %238 : vector<8x32xf32>
    %246 = arith.mulf %245, %243 : vector<8x32xf32>
    %247 = arith.mulf %238, %218 : vector<8x32xf32>
    %248 = arith.addf %246, %247 : vector<8x32xf32>
    %249 = tpu.concatenate %38, %68, %98, %128, %158, %188, %218, %248 in 0 : vector<8x32xf32>, vector<8x32xf32>, vector<8x32xf32>, vector<8x32xf32>, vector<8x32xf32>, vector<8x32xf32>, vector<8x32xf32>, vector<8x32xf32> -> vector<64x32xf32>
    %c0_42 = arith.constant 0 : index
    %c0_43 = arith.constant 0 : index
    %250 = vector.load %arg5[%c0_42, %c0_43] : memref<32x96xf32, #tpu.memory_space<vmem>>, vector<32x96xf32>
    %cst_44 = arith.constant dense<0.000000e+00> : vector<64x96xf32>
    %251 = tpu.matmul %249, %250, %cst_44 {dimension_numbers = #tpu.dot_dimension_numbers<[1], [0], [0], [1], [0, 0, 1, 1], [], []>} : vector<64x32xf32>, vector<32x96xf32>, vector<64x96xf32> -> vector<64x96xf32>
    %c0_45 = arith.constant 0 : index
    %c0_46 = arith.constant 0 : index
    %252 = vector.load %arg7[%c0_45, %c0_46] : memref<1x96xf32, #tpu.memory_space<vmem>>, vector<1x96xf32>
    %253 = vector.broadcast %252 : vector<1x96xf32> to vector<64x96xf32>
    %254 = arith.addf %251, %253 : vector<64x96xf32>
    %c0_47 = arith.constant 0 : index
    %c0_48 = arith.constant 0 : index
    %255 = vector.load %arg6[%c0_47, %c0_48] : memref<32x96xf32, #tpu.memory_space<vmem>>, vector<32x96xf32>
    %c0_49 = arith.constant 0 : index
    %c0_50 = arith.constant 0 : index
    %256 = vector.load %arg8[%c0_49, %c0_50] : memref<1x96xf32, #tpu.memory_space<vmem>>, vector<1x96xf32>
    %cst_51 = arith.constant 0.000000e+00 : f32
    %257 = vector.broadcast %cst_51 : f32 to vector<8x32xf32>
    %258 = vector.extract_strided_slice %254 {offsets = [0, 0], sizes = [8, 96], strides = [1, 1]} : vector<64x96xf32> to vector<8x96xf32>
    %cst_52 = arith.constant dense<0.000000e+00> : vector<8x96xf32>
    %259 = tpu.matmul %257, %255, %cst_52 {dimension_numbers = #tpu.dot_dimension_numbers<[1], [0], [0], [1], [0, 0, 1, 1], [], []>} : vector<8x32xf32>, vector<32x96xf32>, vector<8x96xf32> -> vector<8x96xf32>
    %260 = vector.broadcast %256 : vector<1x96xf32> to vector<8x96xf32>
    %261 = arith.addf %259, %260 : vector<8x96xf32>
    %262 = vector.extract_strided_slice %258 {offsets = [0, 0], sizes = [8, 32], strides = [1, 1]} : vector<8x96xf32> to vector<8x32xf32>
    %263 = vector.extract_strided_slice %261 {offsets = [0, 0], sizes = [8, 32], strides = [1, 1]} : vector<8x96xf32> to vector<8x32xf32>
    %264 = arith.addf %262, %263 : vector<8x32xf32>
    %265 = arith.negf %264 : vector<8x32xf32>
    %266 = math.exp %265 : vector<8x32xf32>
    %cst_53 = arith.constant 1.000000e+00 : f32
    %267 = vector.broadcast %cst_53 : f32 to vector<8x32xf32>
    %268 = arith.addf %267, %266 : vector<8x32xf32>
    %269 = arith.divf %267, %268 : vector<8x32xf32>
    %270 = vector.extract_strided_slice %258 {offsets = [0, 32], sizes = [8, 32], strides = [1, 1]} : vector<8x96xf32> to vector<8x32xf32>
    %271 = vector.extract_strided_slice %261 {offsets = [0, 32], sizes = [8, 32], strides = [1, 1]} : vector<8x96xf32> to vector<8x32xf32>
    %272 = arith.addf %270, %271 : vector<8x32xf32>
    %273 = arith.negf %272 : vector<8x32xf32>
    %274 = math.exp %273 : vector<8x32xf32>
    %cst_54 = arith.constant 1.000000e+00 : f32
    %275 = vector.broadcast %cst_54 : f32 to vector<8x32xf32>
    %276 = arith.addf %275, %274 : vector<8x32xf32>
    %277 = arith.divf %275, %276 : vector<8x32xf32>
    %278 = vector.extract_strided_slice %258 {offsets = [0, 64], sizes = [8, 32], strides = [1, 1]} : vector<8x96xf32> to vector<8x32xf32>
    %279 = vector.extract_strided_slice %261 {offsets = [0, 64], sizes = [8, 32], strides = [1, 1]} : vector<8x96xf32> to vector<8x32xf32>
    %280 = arith.mulf %269, %279 : vector<8x32xf32>
    %281 = arith.addf %278, %280 : vector<8x32xf32>
    %282 = math.tanh %281 : vector<8x32xf32>
    %cst_55 = arith.constant 1.000000e+00 : f32
    %283 = vector.broadcast %cst_55 : f32 to vector<8x32xf32>
    %284 = arith.subf %283, %277 : vector<8x32xf32>
    %285 = arith.mulf %284, %282 : vector<8x32xf32>
    %286 = arith.mulf %277, %257 : vector<8x32xf32>
    %287 = arith.addf %285, %286 : vector<8x32xf32>
    %288 = vector.extract_strided_slice %287 {offsets = [7, 0], sizes = [1, 32], strides = [1, 1]} : vector<8x32xf32> to vector<1x32xf32>
    %289 = vector.extract_strided_slice %254 {offsets = [8, 0], sizes = [8, 96], strides = [1, 1]} : vector<64x96xf32> to vector<8x96xf32>
    %cst_56 = arith.constant dense<0.000000e+00> : vector<8x96xf32>
    %290 = tpu.matmul %287, %255, %cst_56 {dimension_numbers = #tpu.dot_dimension_numbers<[1], [0], [0], [1], [0, 0, 1, 1], [], []>} : vector<8x32xf32>, vector<32x96xf32>, vector<8x96xf32> -> vector<8x96xf32>
    %291 = vector.broadcast %256 : vector<1x96xf32> to vector<8x96xf32>
    %292 = arith.addf %290, %291 : vector<8x96xf32>
    %293 = vector.extract_strided_slice %289 {offsets = [0, 0], sizes = [8, 32], strides = [1, 1]} : vector<8x96xf32> to vector<8x32xf32>
    %294 = vector.extract_strided_slice %292 {offsets = [0, 0], sizes = [8, 32], strides = [1, 1]} : vector<8x96xf32> to vector<8x32xf32>
    %295 = arith.addf %293, %294 : vector<8x32xf32>
    %296 = arith.negf %295 : vector<8x32xf32>
    %297 = math.exp %296 : vector<8x32xf32>
    %cst_57 = arith.constant 1.000000e+00 : f32
    %298 = vector.broadcast %cst_57 : f32 to vector<8x32xf32>
    %299 = arith.addf %298, %297 : vector<8x32xf32>
    %300 = arith.divf %298, %299 : vector<8x32xf32>
    %301 = vector.extract_strided_slice %289 {offsets = [0, 32], sizes = [8, 32], strides = [1, 1]} : vector<8x96xf32> to vector<8x32xf32>
    %302 = vector.extract_strided_slice %292 {offsets = [0, 32], sizes = [8, 32], strides = [1, 1]} : vector<8x96xf32> to vector<8x32xf32>
    %303 = arith.addf %301, %302 : vector<8x32xf32>
    %304 = arith.negf %303 : vector<8x32xf32>
    %305 = math.exp %304 : vector<8x32xf32>
    %cst_58 = arith.constant 1.000000e+00 : f32
    %306 = vector.broadcast %cst_58 : f32 to vector<8x32xf32>
    %307 = arith.addf %306, %305 : vector<8x32xf32>
    %308 = arith.divf %306, %307 : vector<8x32xf32>
    %309 = vector.extract_strided_slice %289 {offsets = [0, 64], sizes = [8, 32], strides = [1, 1]} : vector<8x96xf32> to vector<8x32xf32>
    %310 = vector.extract_strided_slice %292 {offsets = [0, 64], sizes = [8, 32], strides = [1, 1]} : vector<8x96xf32> to vector<8x32xf32>
    %311 = arith.mulf %300, %310 : vector<8x32xf32>
    %312 = arith.addf %309, %311 : vector<8x32xf32>
    %313 = math.tanh %312 : vector<8x32xf32>
    %cst_59 = arith.constant 1.000000e+00 : f32
    %314 = vector.broadcast %cst_59 : f32 to vector<8x32xf32>
    %315 = arith.subf %314, %308 : vector<8x32xf32>
    %316 = arith.mulf %315, %313 : vector<8x32xf32>
    %317 = arith.mulf %308, %287 : vector<8x32xf32>
    %318 = arith.addf %316, %317 : vector<8x32xf32>
    %319 = vector.extract_strided_slice %318 {offsets = [7, 0], sizes = [1, 32], strides = [1, 1]} : vector<8x32xf32> to vector<1x32xf32>
    %320 = vector.extract_strided_slice %254 {offsets = [16, 0], sizes = [8, 96], strides = [1, 1]} : vector<64x96xf32> to vector<8x96xf32>
    %cst_60 = arith.constant dense<0.000000e+00> : vector<8x96xf32>
    %321 = tpu.matmul %318, %255, %cst_60 {dimension_numbers = #tpu.dot_dimension_numbers<[1], [0], [0], [1], [0, 0, 1, 1], [], []>} : vector<8x32xf32>, vector<32x96xf32>, vector<8x96xf32> -> vector<8x96xf32>
    %322 = vector.broadcast %256 : vector<1x96xf32> to vector<8x96xf32>
    %323 = arith.addf %321, %322 : vector<8x96xf32>
    %324 = vector.extract_strided_slice %320 {offsets = [0, 0], sizes = [8, 32], strides = [1, 1]} : vector<8x96xf32> to vector<8x32xf32>
    %325 = vector.extract_strided_slice %323 {offsets = [0, 0], sizes = [8, 32], strides = [1, 1]} : vector<8x96xf32> to vector<8x32xf32>
    %326 = arith.addf %324, %325 : vector<8x32xf32>
    %327 = arith.negf %326 : vector<8x32xf32>
    %328 = math.exp %327 : vector<8x32xf32>
    %cst_61 = arith.constant 1.000000e+00 : f32
    %329 = vector.broadcast %cst_61 : f32 to vector<8x32xf32>
    %330 = arith.addf %329, %328 : vector<8x32xf32>
    %331 = arith.divf %329, %330 : vector<8x32xf32>
    %332 = vector.extract_strided_slice %320 {offsets = [0, 32], sizes = [8, 32], strides = [1, 1]} : vector<8x96xf32> to vector<8x32xf32>
    %333 = vector.extract_strided_slice %323 {offsets = [0, 32], sizes = [8, 32], strides = [1, 1]} : vector<8x96xf32> to vector<8x32xf32>
    %334 = arith.addf %332, %333 : vector<8x32xf32>
    %335 = arith.negf %334 : vector<8x32xf32>
    %336 = math.exp %335 : vector<8x32xf32>
    %cst_62 = arith.constant 1.000000e+00 : f32
    %337 = vector.broadcast %cst_62 : f32 to vector<8x32xf32>
    %338 = arith.addf %337, %336 : vector<8x32xf32>
    %339 = arith.divf %337, %338 : vector<8x32xf32>
    %340 = vector.extract_strided_slice %320 {offsets = [0, 64], sizes = [8, 32], strides = [1, 1]} : vector<8x96xf32> to vector<8x32xf32>
    %341 = vector.extract_strided_slice %323 {offsets = [0, 64], sizes = [8, 32], strides = [1, 1]} : vector<8x96xf32> to vector<8x32xf32>
    %342 = arith.mulf %331, %341 : vector<8x32xf32>
    %343 = arith.addf %340, %342 : vector<8x32xf32>
    %344 = math.tanh %343 : vector<8x32xf32>
    %cst_63 = arith.constant 1.000000e+00 : f32
    %345 = vector.broadcast %cst_63 : f32 to vector<8x32xf32>
    %346 = arith.subf %345, %339 : vector<8x32xf32>
    %347 = arith.mulf %346, %344 : vector<8x32xf32>
    %348 = arith.mulf %339, %318 : vector<8x32xf32>
    %349 = arith.addf %347, %348 : vector<8x32xf32>
    %350 = vector.extract_strided_slice %349 {offsets = [7, 0], sizes = [1, 32], strides = [1, 1]} : vector<8x32xf32> to vector<1x32xf32>
    %351 = vector.extract_strided_slice %254 {offsets = [24, 0], sizes = [8, 96], strides = [1, 1]} : vector<64x96xf32> to vector<8x96xf32>
    %cst_64 = arith.constant dense<0.000000e+00> : vector<8x96xf32>
    %352 = tpu.matmul %349, %255, %cst_64 {dimension_numbers = #tpu.dot_dimension_numbers<[1], [0], [0], [1], [0, 0, 1, 1], [], []>} : vector<8x32xf32>, vector<32x96xf32>, vector<8x96xf32> -> vector<8x96xf32>
    %353 = vector.broadcast %256 : vector<1x96xf32> to vector<8x96xf32>
    %354 = arith.addf %352, %353 : vector<8x96xf32>
    %355 = vector.extract_strided_slice %351 {offsets = [0, 0], sizes = [8, 32], strides = [1, 1]} : vector<8x96xf32> to vector<8x32xf32>
    %356 = vector.extract_strided_slice %354 {offsets = [0, 0], sizes = [8, 32], strides = [1, 1]} : vector<8x96xf32> to vector<8x32xf32>
    %357 = arith.addf %355, %356 : vector<8x32xf32>
    %358 = arith.negf %357 : vector<8x32xf32>
    %359 = math.exp %358 : vector<8x32xf32>
    %cst_65 = arith.constant 1.000000e+00 : f32
    %360 = vector.broadcast %cst_65 : f32 to vector<8x32xf32>
    %361 = arith.addf %360, %359 : vector<8x32xf32>
    %362 = arith.divf %360, %361 : vector<8x32xf32>
    %363 = vector.extract_strided_slice %351 {offsets = [0, 32], sizes = [8, 32], strides = [1, 1]} : vector<8x96xf32> to vector<8x32xf32>
    %364 = vector.extract_strided_slice %354 {offsets = [0, 32], sizes = [8, 32], strides = [1, 1]} : vector<8x96xf32> to vector<8x32xf32>
    %365 = arith.addf %363, %364 : vector<8x32xf32>
    %366 = arith.negf %365 : vector<8x32xf32>
    %367 = math.exp %366 : vector<8x32xf32>
    %cst_66 = arith.constant 1.000000e+00 : f32
    %368 = vector.broadcast %cst_66 : f32 to vector<8x32xf32>
    %369 = arith.addf %368, %367 : vector<8x32xf32>
    %370 = arith.divf %368, %369 : vector<8x32xf32>
    %371 = vector.extract_strided_slice %351 {offsets = [0, 64], sizes = [8, 32], strides = [1, 1]} : vector<8x96xf32> to vector<8x32xf32>
    %372 = vector.extract_strided_slice %354 {offsets = [0, 64], sizes = [8, 32], strides = [1, 1]} : vector<8x96xf32> to vector<8x32xf32>
    %373 = arith.mulf %362, %372 : vector<8x32xf32>
    %374 = arith.addf %371, %373 : vector<8x32xf32>
    %375 = math.tanh %374 : vector<8x32xf32>
    %cst_67 = arith.constant 1.000000e+00 : f32
    %376 = vector.broadcast %cst_67 : f32 to vector<8x32xf32>
    %377 = arith.subf %376, %370 : vector<8x32xf32>
    %378 = arith.mulf %377, %375 : vector<8x32xf32>
    %379 = arith.mulf %370, %349 : vector<8x32xf32>
    %380 = arith.addf %378, %379 : vector<8x32xf32>
    %381 = vector.extract_strided_slice %380 {offsets = [7, 0], sizes = [1, 32], strides = [1, 1]} : vector<8x32xf32> to vector<1x32xf32>
    %382 = vector.extract_strided_slice %254 {offsets = [32, 0], sizes = [8, 96], strides = [1, 1]} : vector<64x96xf32> to vector<8x96xf32>
    %cst_68 = arith.constant dense<0.000000e+00> : vector<8x96xf32>
    %383 = tpu.matmul %380, %255, %cst_68 {dimension_numbers = #tpu.dot_dimension_numbers<[1], [0], [0], [1], [0, 0, 1, 1], [], []>} : vector<8x32xf32>, vector<32x96xf32>, vector<8x96xf32> -> vector<8x96xf32>
    %384 = vector.broadcast %256 : vector<1x96xf32> to vector<8x96xf32>
    %385 = arith.addf %383, %384 : vector<8x96xf32>
    %386 = vector.extract_strided_slice %382 {offsets = [0, 0], sizes = [8, 32], strides = [1, 1]} : vector<8x96xf32> to vector<8x32xf32>
    %387 = vector.extract_strided_slice %385 {offsets = [0, 0], sizes = [8, 32], strides = [1, 1]} : vector<8x96xf32> to vector<8x32xf32>
    %388 = arith.addf %386, %387 : vector<8x32xf32>
    %389 = arith.negf %388 : vector<8x32xf32>
    %390 = math.exp %389 : vector<8x32xf32>
    %cst_69 = arith.constant 1.000000e+00 : f32
    %391 = vector.broadcast %cst_69 : f32 to vector<8x32xf32>
    %392 = arith.addf %391, %390 : vector<8x32xf32>
    %393 = arith.divf %391, %392 : vector<8x32xf32>
    %394 = vector.extract_strided_slice %382 {offsets = [0, 32], sizes = [8, 32], strides = [1, 1]} : vector<8x96xf32> to vector<8x32xf32>
    %395 = vector.extract_strided_slice %385 {offsets = [0, 32], sizes = [8, 32], strides = [1, 1]} : vector<8x96xf32> to vector<8x32xf32>
    %396 = arith.addf %394, %395 : vector<8x32xf32>
    %397 = arith.negf %396 : vector<8x32xf32>
    %398 = math.exp %397 : vector<8x32xf32>
    %cst_70 = arith.constant 1.000000e+00 : f32
    %399 = vector.broadcast %cst_70 : f32 to vector<8x32xf32>
    %400 = arith.addf %399, %398 : vector<8x32xf32>
    %401 = arith.divf %399, %400 : vector<8x32xf32>
    %402 = vector.extract_strided_slice %382 {offsets = [0, 64], sizes = [8, 32], strides = [1, 1]} : vector<8x96xf32> to vector<8x32xf32>
    %403 = vector.extract_strided_slice %385 {offsets = [0, 64], sizes = [8, 32], strides = [1, 1]} : vector<8x96xf32> to vector<8x32xf32>
    %404 = arith.mulf %393, %403 : vector<8x32xf32>
    %405 = arith.addf %402, %404 : vector<8x32xf32>
    %406 = math.tanh %405 : vector<8x32xf32>
    %cst_71 = arith.constant 1.000000e+00 : f32
    %407 = vector.broadcast %cst_71 : f32 to vector<8x32xf32>
    %408 = arith.subf %407, %401 : vector<8x32xf32>
    %409 = arith.mulf %408, %406 : vector<8x32xf32>
    %410 = arith.mulf %401, %380 : vector<8x32xf32>
    %411 = arith.addf %409, %410 : vector<8x32xf32>
    %412 = vector.extract_strided_slice %411 {offsets = [7, 0], sizes = [1, 32], strides = [1, 1]} : vector<8x32xf32> to vector<1x32xf32>
    %413 = vector.extract_strided_slice %254 {offsets = [40, 0], sizes = [8, 96], strides = [1, 1]} : vector<64x96xf32> to vector<8x96xf32>
    %cst_72 = arith.constant dense<0.000000e+00> : vector<8x96xf32>
    %414 = tpu.matmul %411, %255, %cst_72 {dimension_numbers = #tpu.dot_dimension_numbers<[1], [0], [0], [1], [0, 0, 1, 1], [], []>} : vector<8x32xf32>, vector<32x96xf32>, vector<8x96xf32> -> vector<8x96xf32>
    %415 = vector.broadcast %256 : vector<1x96xf32> to vector<8x96xf32>
    %416 = arith.addf %414, %415 : vector<8x96xf32>
    %417 = vector.extract_strided_slice %413 {offsets = [0, 0], sizes = [8, 32], strides = [1, 1]} : vector<8x96xf32> to vector<8x32xf32>
    %418 = vector.extract_strided_slice %416 {offsets = [0, 0], sizes = [8, 32], strides = [1, 1]} : vector<8x96xf32> to vector<8x32xf32>
    %419 = arith.addf %417, %418 : vector<8x32xf32>
    %420 = arith.negf %419 : vector<8x32xf32>
    %421 = math.exp %420 : vector<8x32xf32>
    %cst_73 = arith.constant 1.000000e+00 : f32
    %422 = vector.broadcast %cst_73 : f32 to vector<8x32xf32>
    %423 = arith.addf %422, %421 : vector<8x32xf32>
    %424 = arith.divf %422, %423 : vector<8x32xf32>
    %425 = vector.extract_strided_slice %413 {offsets = [0, 32], sizes = [8, 32], strides = [1, 1]} : vector<8x96xf32> to vector<8x32xf32>
    %426 = vector.extract_strided_slice %416 {offsets = [0, 32], sizes = [8, 32], strides = [1, 1]} : vector<8x96xf32> to vector<8x32xf32>
    %427 = arith.addf %425, %426 : vector<8x32xf32>
    %428 = arith.negf %427 : vector<8x32xf32>
    %429 = math.exp %428 : vector<8x32xf32>
    %cst_74 = arith.constant 1.000000e+00 : f32
    %430 = vector.broadcast %cst_74 : f32 to vector<8x32xf32>
    %431 = arith.addf %430, %429 : vector<8x32xf32>
    %432 = arith.divf %430, %431 : vector<8x32xf32>
    %433 = vector.extract_strided_slice %413 {offsets = [0, 64], sizes = [8, 32], strides = [1, 1]} : vector<8x96xf32> to vector<8x32xf32>
    %434 = vector.extract_strided_slice %416 {offsets = [0, 64], sizes = [8, 32], strides = [1, 1]} : vector<8x96xf32> to vector<8x32xf32>
    %435 = arith.mulf %424, %434 : vector<8x32xf32>
    %436 = arith.addf %433, %435 : vector<8x32xf32>
    %437 = math.tanh %436 : vector<8x32xf32>
    %cst_75 = arith.constant 1.000000e+00 : f32
    %438 = vector.broadcast %cst_75 : f32 to vector<8x32xf32>
    %439 = arith.subf %438, %432 : vector<8x32xf32>
    %440 = arith.mulf %439, %437 : vector<8x32xf32>
    %441 = arith.mulf %432, %411 : vector<8x32xf32>
    %442 = arith.addf %440, %441 : vector<8x32xf32>
    %443 = vector.extract_strided_slice %442 {offsets = [7, 0], sizes = [1, 32], strides = [1, 1]} : vector<8x32xf32> to vector<1x32xf32>
    %444 = vector.extract_strided_slice %254 {offsets = [48, 0], sizes = [8, 96], strides = [1, 1]} : vector<64x96xf32> to vector<8x96xf32>
    %cst_76 = arith.constant dense<0.000000e+00> : vector<8x96xf32>
    %445 = tpu.matmul %442, %255, %cst_76 {dimension_numbers = #tpu.dot_dimension_numbers<[1], [0], [0], [1], [0, 0, 1, 1], [], []>} : vector<8x32xf32>, vector<32x96xf32>, vector<8x96xf32> -> vector<8x96xf32>
    %446 = vector.broadcast %256 : vector<1x96xf32> to vector<8x96xf32>
    %447 = arith.addf %445, %446 : vector<8x96xf32>
    %448 = vector.extract_strided_slice %444 {offsets = [0, 0], sizes = [8, 32], strides = [1, 1]} : vector<8x96xf32> to vector<8x32xf32>
    %449 = vector.extract_strided_slice %447 {offsets = [0, 0], sizes = [8, 32], strides = [1, 1]} : vector<8x96xf32> to vector<8x32xf32>
    %450 = arith.addf %448, %449 : vector<8x32xf32>
    %451 = arith.negf %450 : vector<8x32xf32>
    %452 = math.exp %451 : vector<8x32xf32>
    %cst_77 = arith.constant 1.000000e+00 : f32
    %453 = vector.broadcast %cst_77 : f32 to vector<8x32xf32>
    %454 = arith.addf %453, %452 : vector<8x32xf32>
    %455 = arith.divf %453, %454 : vector<8x32xf32>
    %456 = vector.extract_strided_slice %444 {offsets = [0, 32], sizes = [8, 32], strides = [1, 1]} : vector<8x96xf32> to vector<8x32xf32>
    %457 = vector.extract_strided_slice %447 {offsets = [0, 32], sizes = [8, 32], strides = [1, 1]} : vector<8x96xf32> to vector<8x32xf32>
    %458 = arith.addf %456, %457 : vector<8x32xf32>
    %459 = arith.negf %458 : vector<8x32xf32>
    %460 = math.exp %459 : vector<8x32xf32>
    %cst_78 = arith.constant 1.000000e+00 : f32
    %461 = vector.broadcast %cst_78 : f32 to vector<8x32xf32>
    %462 = arith.addf %461, %460 : vector<8x32xf32>
    %463 = arith.divf %461, %462 : vector<8x32xf32>
    %464 = vector.extract_strided_slice %444 {offsets = [0, 64], sizes = [8, 32], strides = [1, 1]} : vector<8x96xf32> to vector<8x32xf32>
    %465 = vector.extract_strided_slice %447 {offsets = [0, 64], sizes = [8, 32], strides = [1, 1]} : vector<8x96xf32> to vector<8x32xf32>
    %466 = arith.mulf %455, %465 : vector<8x32xf32>
    %467 = arith.addf %464, %466 : vector<8x32xf32>
    %468 = math.tanh %467 : vector<8x32xf32>
    %cst_79 = arith.constant 1.000000e+00 : f32
    %469 = vector.broadcast %cst_79 : f32 to vector<8x32xf32>
    %470 = arith.subf %469, %463 : vector<8x32xf32>
    %471 = arith.mulf %470, %468 : vector<8x32xf32>
    %472 = arith.mulf %463, %442 : vector<8x32xf32>
    %473 = arith.addf %471, %472 : vector<8x32xf32>
    %474 = vector.extract_strided_slice %473 {offsets = [7, 0], sizes = [1, 32], strides = [1, 1]} : vector<8x32xf32> to vector<1x32xf32>
    %475 = vector.extract_strided_slice %254 {offsets = [56, 0], sizes = [8, 96], strides = [1, 1]} : vector<64x96xf32> to vector<8x96xf32>
    %cst_80 = arith.constant dense<0.000000e+00> : vector<8x96xf32>
    %476 = tpu.matmul %473, %255, %cst_80 {dimension_numbers = #tpu.dot_dimension_numbers<[1], [0], [0], [1], [0, 0, 1, 1], [], []>} : vector<8x32xf32>, vector<32x96xf32>, vector<8x96xf32> -> vector<8x96xf32>
    %477 = vector.broadcast %256 : vector<1x96xf32> to vector<8x96xf32>
    %478 = arith.addf %476, %477 : vector<8x96xf32>
    %479 = vector.extract_strided_slice %475 {offsets = [0, 0], sizes = [8, 32], strides = [1, 1]} : vector<8x96xf32> to vector<8x32xf32>
    %480 = vector.extract_strided_slice %478 {offsets = [0, 0], sizes = [8, 32], strides = [1, 1]} : vector<8x96xf32> to vector<8x32xf32>
    %481 = arith.addf %479, %480 : vector<8x32xf32>
    %482 = arith.negf %481 : vector<8x32xf32>
    %483 = math.exp %482 : vector<8x32xf32>
    %cst_81 = arith.constant 1.000000e+00 : f32
    %484 = vector.broadcast %cst_81 : f32 to vector<8x32xf32>
    %485 = arith.addf %484, %483 : vector<8x32xf32>
    %486 = arith.divf %484, %485 : vector<8x32xf32>
    %487 = vector.extract_strided_slice %475 {offsets = [0, 32], sizes = [8, 32], strides = [1, 1]} : vector<8x96xf32> to vector<8x32xf32>
    %488 = vector.extract_strided_slice %478 {offsets = [0, 32], sizes = [8, 32], strides = [1, 1]} : vector<8x96xf32> to vector<8x32xf32>
    %489 = arith.addf %487, %488 : vector<8x32xf32>
    %490 = arith.negf %489 : vector<8x32xf32>
    %491 = math.exp %490 : vector<8x32xf32>
    %cst_82 = arith.constant 1.000000e+00 : f32
    %492 = vector.broadcast %cst_82 : f32 to vector<8x32xf32>
    %493 = arith.addf %492, %491 : vector<8x32xf32>
    %494 = arith.divf %492, %493 : vector<8x32xf32>
    %495 = vector.extract_strided_slice %475 {offsets = [0, 64], sizes = [8, 32], strides = [1, 1]} : vector<8x96xf32> to vector<8x32xf32>
    %496 = vector.extract_strided_slice %478 {offsets = [0, 64], sizes = [8, 32], strides = [1, 1]} : vector<8x96xf32> to vector<8x32xf32>
    %497 = arith.mulf %486, %496 : vector<8x32xf32>
    %498 = arith.addf %495, %497 : vector<8x32xf32>
    %499 = math.tanh %498 : vector<8x32xf32>
    %cst_83 = arith.constant 1.000000e+00 : f32
    %500 = vector.broadcast %cst_83 : f32 to vector<8x32xf32>
    %501 = arith.subf %500, %494 : vector<8x32xf32>
    %502 = arith.mulf %501, %499 : vector<8x32xf32>
    %503 = arith.mulf %494, %473 : vector<8x32xf32>
    %504 = arith.addf %502, %503 : vector<8x32xf32>
    %505 = vector.extract_strided_slice %504 {offsets = [7, 0], sizes = [1, 32], strides = [1, 1]} : vector<8x32xf32> to vector<1x32xf32>
    %506 = tpu.concatenate %288, %319, %350, %381, %412, %443, %474, %505 in 0 : vector<1x32xf32>, vector<1x32xf32>, vector<1x32xf32>, vector<1x32xf32>, vector<1x32xf32>, vector<1x32xf32>, vector<1x32xf32>, vector<1x32xf32> -> vector<8x32xf32>
    %c0_84 = arith.constant 0 : index
    %c0_85 = arith.constant 0 : index
    %507 = vector.load %arg9[%c0_84, %c0_85] : memref<32x128xf32, #tpu.memory_space<vmem>>, vector<32x128xf32>
    %cst_86 = arith.constant dense<0.000000e+00> : vector<8x128xf32>
    %508 = tpu.matmul %506, %507, %cst_86 {dimension_numbers = #tpu.dot_dimension_numbers<[1], [0], [0], [1], [0, 0, 1, 1], [], []>} : vector<8x32xf32>, vector<32x128xf32>, vector<8x128xf32> -> vector<8x128xf32>
    %c0_87 = arith.constant 0 : index
    %c0_88 = arith.constant 0 : index
    %509 = vector.load %arg10[%c0_87, %c0_88] : memref<1x128xf32, #tpu.memory_space<vmem>>, vector<1x128xf32>
    %510 = vector.broadcast %509 : vector<1x128xf32> to vector<8x128xf32>
    %511 = arith.addf %508, %510 : vector<8x128xf32>
    %c0_89 = arith.constant 0 : index
    %c0_90 = arith.constant 0 : index
    %512 = vector.load %arg11[%c0_89, %c0_90] : memref<8x128xf32, #tpu.memory_space<vmem>>, vector<8x128xf32>
    tpu.vector_store %arg11[%c0_89, %c0_90], %511 {strides = array<i32>} : memref<8x128xf32, #tpu.memory_space<vmem>>, vector<8x128xf32>,
    return
  }
}

</mosaic_0001>

<bundles_post_ra>
// kernel: gru_model_forward.1
= control target key start
LH: loop header
LB: loop body
LE: loop exit
PB: predicated region body
PF: predicated region fallthrough
CT: control target
= control target key end

     0   :  { %vm80_vm0 = vcmask 1043456   ;;  %v2573_v2 = vmov 0.0   ;;  %vm55_vm1 = vcmask 31744   ;;  %s3130_s0 = inlined_call_operand.vmem [shape: f32[64,4], index: 0, kind: input, shape index: {}]   ;;  %s3131_s1 = inlined_call_operand.vmem [shape: f32[4,96], index: 1, kind: input, shape index: {}]   ;;  %s3132_s2 = inlined_call_operand.vmem [shape: f32[32,96], index: 2, kind: input, shape index: {}]   ;;  %s3133_s3 = inlined_call_operand.vmem [shape: f32[1,96], index: 3, kind: input, shape index: {}]   ;;  %s3134_s4 = inlined_call_operand.vmem [shape: f32[1,96], index: 4, kind: input, shape index: {}]   ;;  %s3135_s5 = inlined_call_operand.vmem [shape: f32[32,96], index: 5, kind: input, shape index: {}]   ;;  %s3136_s6 = inlined_call_operand.vmem [shape: f32[32,96], index: 6, kind: input, shape index: {}]   ;;  %s3137_s7 = inlined_call_operand.vmem [shape: f32[1,96], index: 7, kind: input, shape index: {}]   ;;  %s3138_s8 = inlined_call_operand.vmem [shape: f32[1,96], index: 8, kind: input, shape index: {}]   ;;  %s3139_s9 = inlined_call_operand.vmem [shape: f32[32,128], index: 9, kind: input, shape index: {}]   ;;  %s3140_s10 = inlined_call_operand.vmem [shape: f32[1,128], index: 10, kind: input, shape index: {}]   ;;  %s3141_s11 = inlined_call_operand.hbm [shape: f32[8,128], index: 11, kind: output, shape index: {}]  }
   0x1   :  { %v2641_v0 = vld [vmem:[%s3132_s2 + $0x18] sm:$0xff]  ;;  %v47_v1 = vld [vmem:[%s3131_s1] sm:$0xf]  ;;  %2243 = vmatprep.subr.mxu1 %v2573_v2  ;;  %v2650_v3 = vld [vmem:[%s3132_s2 + $0x10] sm:$0xff] }
   0x2   :  { %2229 = vmatprep.subr.msk.mxu0 %vm80_vm0, %v47_v1  ;;  %v39_v4 = vld [vmem:[%s3130_s0] sm:$0xff]  ;;  %v40_v5 = vld [vmem:[%s3130_s0 + $0x8] sm:$0xff]  ;;  %2244 = vmatpush3.msra.mxu1 %v2641_v0 }
   0x3   :  { %2230 = vmatpush3.msk.msra.mxu0 %vm80_vm0, %v47_v1 }
   0x4   :  { %16 = vsyncpa [#allocation3], 0  ;;  %2245 = vmatprep.subr.mxu1 %v2573_v2  ;;  %2231 = vmatprep.mubr.msk.f32.mxu0 %vm55_vm1, %v39_v4  ;;  %v2666_v6 = vld [vmem:[%s3132_s2 + $0x8] sm:$0xff]  ;;  %v2674_v7 = vld [vmem:[%s3132_s2] sm:$0xff]  ;;  %vm2574_vm2 = vmmov 0   ;;  %s2575_s12 = smov 64  }
   0x5   :  { %2246 = vmatpush3.msra.mxu1 %v2650_v3  ;;  %2232 = vmatmul.mubr.msk.f32.vlgmr.msra.gmra.mxu0 %vm55_vm1, %v40_v5  ;;  %v2705_v8 = vld [vmem:[%s3134_s4] ss:$0 sm:$0xff]  ;;  %vm200_vm3 = vcmask 261120   ;;  %v41_v45 = vld [vmem:[%s3130_s0 + $0x10] sm:$0xff]  ;;  %v42_v46 = vld [vmem:[%s3130_s0 + $0x18] sm:$0xff]  ;;  %vm1956_vm4 = vcmask 1040384  }
   0x6   :  { %2247 = vmatprep.subr.mxu1 %v2573_v2  ;;  %2251 = vmatprep.mubr.msk.f32.mxu1 %vm2574_vm2, %v2573_v2  ;;  %v2712_v13 = vld [vmem:[%s3133_s3] ss:$0 sm:$0xff]  ;;  %s2576_s3 = smov 96   ;;  %v44_v48 = vld [vmem:[%s3130_s0 + $0x28] sm:$0xff]  ;;  %v45_v49 = vld [vmem:[%s3130_s0 + $0x30] sm:$0xff]  ;;  %vm1958_vm5 = vcmask 1041408  }
   0x7   :  { %2248 = vmatpush3.msra.mxu1 %v2666_v6  ;;  %2265 = vmatprep.subr.mxu0 %v2573_v2  ;;  %v43_v47 = vld [vmem:[%s3130_s0 + $0x20] sm:$0xff]  ;;  %v46_v50 = vld [vmem:[%s3130_s0 + $0x38] sm:$0xff]  ;;  %vm1960_vm6 = vcmask 1042432   ;;  %vm1963_vm7 = vcmask 1044480   ;;  %vm1965_vm8 = vcmask 1045504   ;;  %vm1967_vm9 = vcmask 1046528  }
   0x8   :  { %2249 = vmatprep.subr.mxu1 %v2573_v2  ;;  %2266 = vmatpush3.msra.mxu0 %v2641_v0  ;;  %s2577_s1 = smov [#allocation2]  }
   0x9   :  { %2250 = vmatpush3.msra.mxu1 %v2674_v7  ;;  %2267 = vmatprep.subr.mxu0 %v2573_v2  ;;  %s2062_s27 = sshll.u32 %s2577_s1, 4  ;;  %s2063_s27 = int_to_ptr.vmem [resolvable:$true] %s2062_s27 }
   0xa   :  { %2252 = vmatmul.mubr.f32.vlgmr.msra.gmra.mxu1 %v2573_v2  ;;  %2254 = vmatprep.subr.mxu1 %v2573_v2  ;;  %s2551_s28 = scalar_lea.vmem %s2063_s27, 128  ;;  %p2556_p1 = scmp.lt.s32.totalorder %s2063_s27, %s2063_s27 }
   0xb   :  { %2255 = vmatpush3.msra.mxu1 %v2641_v0  ;;  %2262 = vmatprep.mubr.msk.f32.mxu1 %vm2574_vm2, %v2573_v2  ;;  %p2552_p0 = scmp.ne.s32.totalorder %s2063_s27, %s2551_s28  ;;  %p2557_p2 = scmp.lt.s32.totalorder %s2551_s28, %s2551_s28 }
   0xc   :  { %2256 = vmatprep.subr.mxu1 %v2573_v2  ;;  %2268 = vmatpush3.msra.mxu0 %v2650_v3 }
   0xd   :  { %2257 = vmatpush3.msra.mxu1 %v2650_v3  ;;  %2269 = vmatprep.subr.mxu0 %v2573_v2  ;;  %p2558_p3 = por %p2557_p2, %p2556_p1 }
   0xe   :  { %2258 = vmatprep.subr.mxu1 %v2573_v2  ;;  %2270 = vmatpush3.msra.mxu0 %v2666_v6 }
   0xf   :  { %2259 = vmatpush3.msra.mxu1 %v2666_v6  ;;  %2271 = vmatprep.subr.mxu0 %v2573_v2  ;;  %p2559_p4 = pnand %p2558_p3, %p2552_p0 }
  0x10   :  { %2260 = vmatprep.subr.mxu1 %v2573_v2  ;;  %2272 = vmatpush3.msra.mxu0 %v2674_v7 }
  0x11   :  { %2261 = vmatpush3.msra.mxu1 %v2674_v7  ;;  %2287 = vmatprep.subr.mxu0 %v2573_v2 }
  0x12   :  { %2276 = vmatprep.subr.mxu1 %v2573_v2  ;;  %2234 = vmatprep.mubr.msk.f32.mxu0 %vm55_vm1, %v41_v45 }
  0x13   :  { %2235 = vmatmul.mubr.msk.f32.gmra.mxu0 %vm55_vm1, %v42_v46 }
  0x14   :  { %2237 = vmatprep.mubr.msk.f32.mxu0 %vm55_vm1, %v43_v47 }
  0x17   :  { %2238 = vmatmul.mubr.msk.f32.gmra.mxu0 %vm55_vm1, %v44_v48 }
  0x18   :  { %2240 = vmatprep.mubr.msk.f32.mxu0 %vm55_vm1, %v45_v49 }
  0x1b   :  { %2241 = vmatmul.mubr.msk.f32.gmra.mxu0 %vm55_vm1, %v46_v50 }
  0x1c   :  { %2273 = vmatprep.mubr.msk.f32.mxu0 %vm2574_vm2, %v2573_v2 }
  0xc5   :  { %v2233_v12 = vpop.f32.mrf.mxu0 }
  0xc6   :  { %v156_v35 = vadd.f32 %v2233_v12, %v2712_v13 }
  0xc7   :  { %v150_v14 = vpop.f32.mrf.mxu0 }
  0xc8   :  { %v151_v15 = vadd.f32 %v2712_v13, %v150_v14 }
  0xca   :  { %v270_v9 = vpop.f32.mrf.mxu1 }
  0xcb   :  { %v271_v10 = vadd.f32 %v2705_v8, %v270_v9 }
  0xcc   :  { %v2253_v11 = vpop.f32.mrf.mxu1 }
  0xcd   :  { %282 = vrot.lane.b32.xlu0 %v271_v10, %s2575_s12  ;;  %v274_v16 = vadd.f32 %v271_v10, %v151_v15 }
  0xcf   :  { %v2081_v17 = vmul.f32 -1.442695, %v274_v16 }
  0xd1   :  { %2455 = vpow2.f32 %v2081_v17 }
  0xd3   :  { %v2236_v58 = vpop.f32.mrf.mxu0 }
  0xd5   :  { %v160_v59 = vpop.f32.mrf.mxu0 }
  0xd6   :  { %v161_v9 = vadd.f32 %v2712_v13, %v160_v59 }
  0xd7   :  { %v2778_v60 = vpop.f32.mrf.mxu0 }
  0xd9   :  { %v2780_v61 = vpop.f32.mrf.mxu0 }
  0xdb   :  { %v2782_v62 = vpop.f32.mrf.mxu0 }
  0xdd   :  { %v2784_v63 = vpop.f32.mrf.mxu0 }
  0xde   :  { %v2456_v18 = vpop.eup %2455 }
  0xdf   :  { %v278_v19 = vadd.f32 1.0, %v2456_v18 }
  0xe1   :  { %2457 = vrcp.f32 %v278_v19 }
  0xee   :  { %v2458_v20 = vpop.eup %2457 }
  0xef   :  { %v292_v26 = vsub.f32 1.0, %v2458_v20  ;;  %v298_v28 = vmul.f32 0.0, %v2458_v20 }
 0x13f   :  { %v283_v21 = vpop.permute.xlu0 %282 }
 0x140   :  { %v285_v22 = vmul.f32 %v2458_v20, %v283_v21 }
 0x142   :  { %287 = vrot.lane.b32.xlu0 %v285_v22, %s2575_s12 }
 0x1b4   :  { %v288_v23 = vpop.permute.xlu0 %287 }
 0x1b5   :  { %v290_v24 = vadd.f32 %v288_v23, %v151_v15 }
 0x1b7   :  { %2459 = vtanh.f32 %v290_v24 }
 0x1c4   :  { %v2460_v25 = vpop.eup %2459 }
 0x1c5   :  { %294 = vrot.lane.b32.xlu1 %v2460_v25, %s2576_s3 }
 0x237   :  { %v295_v27 = vpop.permute.xlu1 %294 }
 0x238   :  { %v297_v29 = vmul.f32 %v295_v27, %v292_v26 }
 0x23a   :  { %v299_v30 = vadd.f32 %v298_v28, %v297_v29 }
 0x23c   :  { %301 = vrot.lane.b32.xlu1 %v299_v30, %s2576_s3 }
 0x2ae   :  { %v2718_v31 = vpop.permute.xlu1 %301 }
 0x2af   :  { %2263 = vmatmul.mubr.msk.f32.vlgmr.msra.gmra.mxu1 %vm200_vm3, %v2718_v31 }
 0x2b0   :  { %2277 = vmatpush3.msra.mxu1 %v2641_v0  ;;  %2284 = vmatprep.mubr.msk.f32.mxu1 %vm2574_vm2, %v2573_v2 }
 0x2b1   :  { %2278 = vmatprep.subr.mxu1 %v2573_v2 }
 0x2b2   :  { %2279 = vmatpush3.msra.mxu1 %v2650_v3 }
 0x2b3   :  { %2280 = vmatprep.subr.mxu1 %v2573_v2 }
 0x2b4   :  { %2281 = vmatpush3.msra.mxu1 %v2666_v6 }
 0x2b5   :  { %2282 = vmatprep.subr.mxu1 %v2573_v2 }
 0x2b6   :  { %2283 = vmatpush3.msra.mxu1 %v2674_v7 }
 0x2b7   :  { %2298 = vmatprep.subr.mxu1 %v2573_v2 }
 0x36f   :  { %v371_v32 = vpop.f32.mrf.mxu1 }
 0x370   :  { %v372_v33 = vadd.f32 %v2705_v8, %v371_v32 }
 0x371   :  { %v2264_v34 = vpop.f32.mrf.mxu1 }
 0x372   :  { %383 = vrot.lane.b32.xlu0 %v372_v33, %s2575_s12  ;;  %v375_v36 = vadd.f32 %v372_v33, %v156_v35 }
 0x374   :  { %v2083_v37 = vmul.f32 -1.442695, %v375_v36 }
 0x376   :  { %2461 = vpow2.f32 %v2083_v37 }
 0x383   :  { %v2462_v38 = vpop.eup %2461 }
 0x384   :  { %v379_v39 = vadd.f32 1.0, %v2462_v38 }
 0x386   :  { %2463 = vrcp.f32 %v379_v39 }
 0x393   :  { %v2464_v40 = vpop.eup %2463 }
 0x394   :  { %v393_v52 = vsub.f32 1.0, %v2464_v40  ;;  %v399_v54 = vmul.f32 %v2464_v40, %v299_v30  ;;  %v166_v30 = vadd.f32 %v2236_v58, %v2712_v13 }
 0x3e4   :  { %v384_v41 = vpop.permute.xlu0 %383 }
 0x3e5   :  { %v386_v42 = vmul.f32 %v2464_v40, %v384_v41 }
 0x3e7   :  { %388 = vrot.lane.b32.xlu1 %v386_v42, %s2575_s12 }
 0x459   :  { %v389_v43 = vpop.permute.xlu1 %388 }
 0x45a   :  { %v391_v44 = vadd.f32 %v389_v43, %v156_v35 }
 0x45c   :  { %2465 = vtanh.f32 %v391_v44 }
 0x469   :  { %v2466_v51 = vpop.eup %2465 }
 0x46a   :  { %395 = vrot.lane.b32.xlu0 %v2466_v51, %s2576_s3  ;;  %v171_v51 = vadd.f32 %v2712_v13, %v2780_v61 }
 0x4dc   :  { %v396_v53 = vpop.permute.xlu0 %395 }
 0x4dd   :  { %v398_v55 = vmul.f32 %v396_v53, %v393_v52 }
 0x4df   :  { %v400_v56 = vadd.f32 %v399_v54, %v398_v55 }
 0x4e1   :  { %402 = vrot.lane.b32.xlu1 %v400_v56, %s2576_s3 }
 0x553   :  { %v2764_v57 = vpop.permute.xlu1 %402 }
 0x554   :  { %2274 = vmatmul.mubr.msk.f32.vlgmr.msra.gmra.mxu0 %vm200_vm3, %v2764_v57 }
 0x555   :  { %2288 = vmatpush3.msra.mxu0 %v2641_v0  ;;  %2295 = vmatprep.mubr.msk.f32.mxu0 %vm2574_vm2, %v2573_v2 }
 0x556   :  { %2289 = vmatprep.subr.mxu0 %v2573_v2 }
 0x557   :  { %2290 = vmatpush3.msra.mxu0 %v2650_v3 }
 0x558   :  { %2291 = vmatprep.subr.mxu0 %v2573_v2 }
 0x559   :  { %2292 = vmatpush3.msra.mxu0 %v2666_v6 }
 0x55a   :  { %2293 = vmatprep.subr.mxu0 %v2573_v2 }
 0x55b   :  { %2294 = vmatpush3.msra.mxu0 %v2674_v7 }
 0x55c   :  { %2309 = vmatprep.subr.mxu0 %v2573_v2 }
 0x614   :  { %v472_v1 = vpop.f32.mrf.mxu0 }
 0x615   :  { %v473_v4 = vadd.f32 %v2705_v8, %v472_v1 }
 0x616   :  { %v2275_v5 = vpop.f32.mrf.mxu0 }
 0x617   :  { %484 = vrot.lane.b32.xlu0 %v473_v4, %s2575_s12  ;;  %v476_v10 = vadd.f32 %v473_v4, %v161_v9 }
 0x619   :  { %v2085_v11 = vmul.f32 -1.442695, %v476_v10 }
 0x61b   :  { %2467 = vpow2.f32 %v2085_v11 }
 0x628   :  { %v2468_v12 = vpop.eup %2467 }
 0x629   :  { %v480_v14 = vadd.f32 1.0, %v2468_v12 }
 0x62b   :  { %2469 = vrcp.f32 %v480_v14 }
 0x638   :  { %v2470_v15 = vpop.eup %2469 }
 0x639   :  { %v494_v21 = vsub.f32 1.0, %v2470_v15  ;;  %v500_v23 = vmul.f32 %v2470_v15, %v400_v56 }
 0x689   :  { %v485_v16 = vpop.permute.xlu0 %484 }
 0x68a   :  { %v487_v17 = vmul.f32 %v2470_v15, %v485_v16 }
 0x68c   :  { %489 = vrot.lane.b32.xlu1 %v487_v17, %s2575_s12  ;;  %v176_v17 = vadd.f32 %v2778_v60, %v2712_v13 }
 0x6fe   :  { %v490_v18 = vpop.permute.xlu1 %489 }
 0x6ff   :  { %v492_v19 = vadd.f32 %v490_v18, %v161_v9 }
 0x701   :  { %2471 = vtanh.f32 %v492_v19 }
 0x70e   :  { %v2472_v20 = vpop.eup %2471 }
 0x70f   :  { %496 = vrot.lane.b32.xlu0 %v2472_v20, %s2576_s3 }
 0x781   :  { %v497_v22 = vpop.permute.xlu0 %496 }
 0x782   :  { %v499_v24 = vmul.f32 %v497_v22, %v494_v21 }
 0x784   :  { %v501_v25 = vadd.f32 %v500_v23, %v499_v24  ;;  %v1010_v24 = vld [vmem:[%s3135_s5 + $0x18] sm:$0xff] }
 0x786   :  { %503 = vrot.lane.b32.xlu1 %v501_v25, %s2576_s3 }
 0x7f8   :  { %v2792_v26 = vpop.permute.xlu1 %503 }
 0x7f9   :  { %2285 = vmatmul.mubr.msk.f32.vlgmr.msra.gmra.mxu1 %vm200_vm3, %v2792_v26 }
 0x7fa   :  { %2299 = vmatpush3.msra.mxu1 %v2641_v0  ;;  %2306 = vmatprep.mubr.msk.f32.mxu1 %vm2574_vm2, %v2573_v2 }
 0x7fb   :  { %2300 = vmatprep.subr.mxu1 %v2573_v2 }
 0x7fc   :  { %2301 = vmatpush3.msra.mxu1 %v2650_v3 }
 0x7fd   :  { %2302 = vmatprep.subr.mxu1 %v2573_v2 }
 0x7fe   :  { %2303 = vmatpush3.msra.mxu1 %v2666_v6 }
 0x7ff   :  { %2304 = vmatprep.subr.mxu1 %v2573_v2 }
 0x800   :  { %2305 = vmatpush3.msra.mxu1 %v2674_v7 }
 0x801   :  { %2320 = vmatprep.subr.mxu1 %v2573_v2 }
 0x8b9   :  { %v573_v27 = vpop.f32.mrf.mxu1 }
 0x8ba   :  { %v574_v28 = vadd.f32 %v2705_v8, %v573_v27 }
 0x8bb   :  { %v2286_v29 = vpop.f32.mrf.mxu1 }
 0x8bc   :  { %585 = vrot.lane.b32.xlu0 %v574_v28, %s2575_s12  ;;  %v577_v32 = vadd.f32 %v574_v28, %v166_v30 }
 0x8be   :  { %v2087_v33 = vmul.f32 -1.442695, %v577_v32 }
 0x8c0   :  { %2473 = vpow2.f32 %v2087_v33  ;;  %v1009_v33 = vld [vmem:[%s3135_s5 + $0x10] sm:$0xff] }
 0x8cd   :  { %v2474_v34 = vpop.eup %2473 }
 0x8ce   :  { %v581_v35 = vadd.f32 1.0, %v2474_v34  ;;  %v1008_v34 = vld [vmem:[%s3135_s5 + $0x8] sm:$0xff] }
 0x8d0   :  { %2475 = vrcp.f32 %v581_v35  ;;  %v1007_v35 = vld [vmem:[%s3135_s5] sm:$0xff] }
 0x8dd   :  { %v2476_v36 = vpop.eup %2475 }
 0x8de   :  { %v595_v42 = vsub.f32 1.0, %v2476_v36  ;;  %v601_v44 = vmul.f32 %v2476_v36, %v501_v25 }
 0x92e   :  { %v586_v37 = vpop.permute.xlu0 %585 }
 0x92f   :  { %v588_v38 = vmul.f32 %v2476_v36, %v586_v37 }
 0x931   :  { %590 = vrot.lane.b32.xlu1 %v588_v38, %s2575_s12 }
 0x9a3   :  { %v591_v39 = vpop.permute.xlu1 %590 }
 0x9a4   :  { %v593_v40 = vadd.f32 %v591_v39, %v166_v30 }
 0x9a6   :  { %2477 = vtanh.f32 %v593_v40 }
 0x9b3   :  { %v2478_v41 = vpop.eup %2477 }
 0x9b4   :  { %597 = vrot.lane.b32.xlu0 %v2478_v41, %s2576_s3 }
 0xa26   :  { %v598_v43 = vpop.permute.xlu0 %597 }
 0xa27   :  { %v600_v45 = vmul.f32 %v598_v43, %v595_v42 }
 0xa29   :  { %v602_v46 = vadd.f32 %v601_v44, %v600_v45 }
 0xa2b   :  { %604 = vrot.lane.b32.xlu1 %v602_v46, %s2576_s3 }
 0xa9d   :  { %v2812_v47 = vpop.permute.xlu1 %604 }
 0xa9e   :  { %2296 = vmatmul.mubr.msk.f32.vlgmr.msra.gmra.mxu0 %vm200_vm3, %v2812_v47 }
 0xa9f   :  { %2310 = vmatpush3.msra.mxu0 %v2641_v0  ;;  %2317 = vmatprep.mubr.msk.f32.mxu0 %vm2574_vm2, %v2573_v2 }
 0xaa0   :  { %2311 = vmatprep.subr.mxu0 %v2573_v2 }
 0xaa1   :  { %2312 = vmatpush3.msra.mxu0 %v2650_v3 }
 0xaa2   :  { %2313 = vmatprep.subr.mxu0 %v2573_v2 }
 0xaa3   :  { %2314 = vmatpush3.msra.mxu0 %v2666_v6 }
 0xaa4   :  { %2315 = vmatprep.subr.mxu0 %v2573_v2 }
 0xaa5   :  { %2316 = vmatpush3.msra.mxu0 %v2674_v7 }
 0xaa6   :  { %2331 = vmatprep.subr.mxu0 %v1010_v24 }
 0xb5e   :  { %v674_v48 = vpop.f32.mrf.mxu0 }
 0xb5f   :  { %v675_v49 = vadd.f32 %v2705_v8, %v674_v48  ;;  %v2896_v48 = vld [vmem:[%s3136_s6 + $0x8] sm:$0xff] }
 0xb60   :  { %v2297_v50 = vpop.f32.mrf.mxu0 }
 0xb61   :  { %686 = vrot.lane.b32.xlu0 %v675_v49, %s2575_s12  ;;  %v678_v52 = vadd.f32 %v675_v49, %v171_v51  ;;  %v2903_v49 = vld [vmem:[%s3136_s6] sm:$0xff] }
 0xb63   :  { %v2089_v53 = vmul.f32 -1.442695, %v678_v52 }
 0xb65   :  { %2479 = vpow2.f32 %v2089_v53 }
 0xb72   :  { %v2480_v54 = vpop.eup %2479 }
 0xb73   :  { %v682_v55 = vadd.f32 1.0, %v2480_v54 }
 0xb75   :  { %2481 = vrcp.f32 %v682_v55 }
 0xb82   :  { %v2482_v56 = vpop.eup %2481 }
 0xb83   :  { %v696_v9 = vsub.f32 1.0, %v2482_v56  ;;  %v702_v61 = vmul.f32 %v2482_v56, %v602_v46 }
 0xbd3   :  { %v687_v58 = vpop.permute.xlu0 %686 }
 0xbd4   :  { %v689_v59 = vmul.f32 %v2482_v56, %v687_v58 }
 0xbd6   :  { %691 = vrot.lane.b32.xlu1 %v689_v59, %s2575_s12  ;;  %v2938_v59 = vld [vmem:[%s3138_s8] ss:$0 sm:$0xff] }
 0xc48   :  { %v692_v1 = vpop.permute.xlu1 %691 }
 0xc49   :  { %v694_v4 = vadd.f32 %v692_v1, %v171_v51 }
 0xc4b   :  { %2483 = vtanh.f32 %v694_v4 }
 0xc58   :  { %v2484_v5 = vpop.eup %2483 }
 0xc59   :  { %698 = vrot.lane.b32.xlu0 %v2484_v5, %s2576_s3 }
 0xccb   :  { %v699_v10 = vpop.permute.xlu0 %698 }
 0xccc   :  { %v701_v11 = vmul.f32 %v699_v10, %v696_v9 }
 0xcce   :  { %v703_v12 = vadd.f32 %v702_v61, %v701_v11  ;;  %v2947_v61 = vld [vmem:[%s3137_s7] ss:$0 sm:$0xff] }
 0xcd0   :  { %705 = vrot.lane.b32.xlu1 %v703_v12, %s2576_s3 }
 0xd42   :  { %v706_v14 = vpop.permute.xlu1 %705 }
 0xd43   :  { %2307 = vmatmul.mubr.msk.f32.vlgmr.msra.gmra.mxu1 %vm200_vm3, %v706_v14 }
 0xd44   :  { %2321 = vmatpush3.msra.mxu1 %v2641_v0  ;;  %2328 = vmatprep.mubr.msk.f32.mxu1 %vm2574_vm2, %v2573_v2 }
 0xd45   :  { %2322 = vmatprep.subr.mxu1 %v2573_v2 }
 0xd46   :  { %2323 = vmatpush3.msra.mxu1 %v2650_v3 }
 0xd47   :  { %2324 = vmatprep.subr.mxu1 %v2573_v2 }
 0xd48   :  { %2325 = vmatpush3.msra.mxu1 %v2666_v6 }
 0xd49   :  { %2326 = vmatprep.subr.mxu1 %v2573_v2 }
 0xd4a   :  { %2327 = vmatpush3.msra.mxu1 %v2674_v7 }
 0xd4b   :  { %2351 = vmatprep.subr.mxu1 %v2573_v2 }
 0xe03   :  { %v775_v15 = vpop.f32.mrf.mxu1 }
 0xe04   :  { %v776_v0 = vadd.f32 %v2705_v8, %v775_v15 }
 0xe05   :  { %v2308_v16 = vpop.f32.mrf.mxu1 }
 0xe06   :  { %787 = vrot.lane.b32.xlu0 %v776_v0, %s2575_s12  ;;  %v779_v3 = vadd.f32 %v776_v0, %v176_v17 }
 0xe08   :  { %v2091_v18 = vmul.f32 -1.442695, %v779_v3 }
 0xe0a   :  { %2485 = vpow2.f32 %v2091_v18 }
 0xe17   :  { %v2486_v19 = vpop.eup %2485 }
 0xe18   :  { %v783_v6 = vadd.f32 1.0, %v2486_v19 }
 0xe1a   :  { %2487 = vrcp.f32 %v783_v6 }
 0xe27   :  { %v2488_v20 = vpop.eup %2487 }
 0xe28   :  { %v797_v25 = vsub.f32 1.0, %v2488_v20  ;;  %v803_v28 = vmul.f32 %v2488_v20, %v703_v12 }
 0xe78   :  { %v788_v21 = vpop.permute.xlu0 %787 }
 0xe79   :  { %v790_v7 = vmul.f32 %v2488_v20, %v788_v21  ;;  %v186_v21 = vadd.f32 %v2782_v62, %v2712_v13 }
 0xe7b   :  { %792 = vrot.lane.b32.xlu1 %v790_v7, %s2575_s12 }
 0xeed   :  { %v793_v22 = vpop.permute.xlu1 %792 }
 0xeee   :  { %v795_v23 = vadd.f32 %v793_v22, %v176_v17 }
 0xef0   :  { %2489 = vtanh.f32 %v795_v23 }
 0xefd   :  { %v2490_v60 = vpop.eup %2489 }
 0xefe   :  { %799 = vrot.lane.b32.xlu0 %v2490_v60, %s2576_s3 }
 0xf70   :  { %v800_v27 = vpop.permute.xlu0 %799 }
 0xf71   :  { %v802_v29 = vmul.f32 %v800_v27, %v797_v25 }
 0xf73   :  { %v804_v30 = vadd.f32 %v803_v28, %v802_v29 }
 0xf75   :  { %806 = vrot.lane.b32.xlu1 %v804_v30, %s2576_s3 }
 0xfe7   :  { %v807_v32 = vpop.permute.xlu1 %806 }
 0xfe8   :  { %2318 = vmatmul.mubr.msk.f32.vlgmr.msra.gmra.mxu0 %vm200_vm3, %v807_v32 }
 0xfe9   :  { %2332 = vmatpush3.msra.mxu0 %v1010_v24  ;;  %2339 = vmatprep.mubr.msk.f32.mxu0 %vm200_vm3, %v2718_v31 }
 0xfea   :  { %2333 = vmatprep.subr.mxu0 %v1009_v33 }
 0xfeb   :  { %2334 = vmatpush3.msra.mxu0 %v1009_v33 }
 0xfec   :  { %2335 = vmatprep.subr.mxu0 %v1008_v34 }
 0xfed   :  { %2336 = vmatpush3.msra.mxu0 %v1008_v34 }
 0xfee   :  { %2337 = vmatprep.subr.mxu0 %v1007_v35 }
 0xfef   :  { %2338 = vmatpush3.msra.mxu0 %v1007_v35 }
 0xff0   :  { %2340 = vmatmul.mubr.msk.f32.vlgmr.msra.gmra.mxu0 %vm200_vm3, %v2764_v57  ;;  %2373 = vmatprep.subr.mxu0 %v2573_v2  ;;  %v181_v57 = vadd.f32 %v2712_v13, %v2784_v63  ;;  %v2883_v63 = vld [vmem:[%s3136_s6 + $0x18] sm:$0xff] }
 0xff1   :  { %2342 = vmatprep.mubr.msk.f32.mxu0 %vm200_vm3, %v2792_v26  ;;  %2374 = vmatpush3.msra.mxu0 %v2883_v63 }
 0xff2   :  { %2375 = vmatprep.subr.mxu0 %v2573_v2 }
 0xff4   :  { %2343 = vmatmul.mubr.msk.f32.gmra.mxu0 %vm200_vm3, %v2812_v47  ;;  %v2889_v47 = vld [vmem:[%s3136_s6 + $0x10] sm:$0xff] }
 0xff5   :  { %2345 = vmatprep.mubr.msk.f32.mxu0 %vm200_vm3, %v706_v14  ;;  %2376 = vmatpush3.msra.mxu0 %v2889_v47 }
 0xff6   :  { %2377 = vmatprep.subr.mxu0 %v2573_v2 }
 0xff7   :  { %2378 = vmatpush3.msra.mxu0 %v2896_v48 }
 0xff8   :  { %2346 = vmatmul.mubr.msk.f32.gmra.mxu0 %vm200_vm3, %v807_v32  ;;  %2379 = vmatprep.subr.mxu0 %v2573_v2 }
 0xff9   :  { %2380 = vmatpush3.msra.mxu0 %v2903_v49 }
 0xffa   :  { %2395 = vmatprep.subr.mxu0 %v2573_v2 }
0x10a8   :  { %v876_v31 = vpop.f32.mrf.mxu0 }
0x10a9   :  { %v877_v36 = vadd.f32 %v2705_v8, %v876_v31 }
0x10aa   :  { %v2319_v37 = vpop.f32.mrf.mxu0 }
0x10ab   :  { %888 = vrot.lane.b32.xlu0 %v877_v36, %s2575_s12  ;;  %v880_v38 = vadd.f32 %v877_v36, %v181_v57 }
0x10ad   :  { %v2093_v39 = vmul.f32 -1.442695, %v880_v38 }
0x10af   :  { %2491 = vpow2.f32 %v2093_v39 }
0x10b0   :  { %v2942_v9 = vpop.f32.mrf.mxu0 }
0x10b2   :  { %v1089_v10 = vpop.f32.mrf.mxu0 }
0x10b3   :  { %v1090_v11 = vadd.f32 %v2947_v61, %v1089_v10 }
0x10bc   :  { %v2492_v26 = vpop.eup %2491 }
0x10bd   :  { %v884_v40 = vadd.f32 1.0, %v2492_v26 }
0x10bf   :  { %2493 = vrcp.f32 %v884_v40 }
0x10cc   :  { %v2494_v41 = vpop.eup %2493 }
0x10cd   :  { %v898_v50 = vsub.f32 1.0, %v2494_v41  ;;  %v904_v52 = vmul.f32 %v2494_v41, %v804_v30 }
0x111d   :  { %v889_v42 = vpop.permute.xlu0 %888 }
0x111e   :  { %v891_v43 = vmul.f32 %v2494_v41, %v889_v42  ;;  %v1095_v41 = vadd.f32 %v2942_v9, %v2947_v61  ;;  %v2344_v9 = vpop.f32.mrf.mxu0 }
0x1120   :  { %893 = vrot.lane.b32.xlu1 %v891_v43, %s2575_s12  ;;  %v1099_v10 = vpop.f32.mrf.mxu0 }
0x1192   :  { %v894_v44 = vpop.permute.xlu1 %893 }
0x1193   :  { %v896_v45 = vadd.f32 %v894_v44, %v181_v57 }
0x1195   :  { %2495 = vtanh.f32 %v896_v45 }
0x11a2   :  { %v2496_v46 = vpop.eup %2495 }
0x11a3   :  { %900 = vrot.lane.b32.xlu0 %v2496_v46, %s2576_s3 }
0x1215   :  { %v901_v51 = vpop.permute.xlu0 %900 }
0x1216   :  { %v903_v53 = vmul.f32 %v901_v51, %v898_v50 }
0x1218   :  { %v2908_v54 = vadd.f32 %v904_v52, %v903_v53 }
0x121a   :  { %907 = vrot.lane.b32.xlu1 %v2908_v54, %s2576_s3 }
0x128c   :  { %v908_v55 = vpop.permute.xlu1 %907 }
0x128d   :  { %2329 = vmatmul.mubr.msk.f32.vlgmr.msra.gmra.mxu1 %vm200_vm3, %v908_v55  ;;  %2348 = vmatprep.mubr.msk.f32.mxu0 %vm200_vm3, %v908_v55 }
0x128e   :  { %2352 = vmatpush3.msra.mxu1 %v2883_v63  ;;  %2359 = vmatprep.mubr.msk.f32.mxu1 %vm2574_vm2, %v2573_v2 }
0x128f   :  { %2353 = vmatprep.subr.mxu1 %v2573_v2 }
0x1290   :  { %2354 = vmatpush3.msra.mxu1 %v2889_v47 }
0x1291   :  { %2355 = vmatprep.subr.mxu1 %v2573_v2 }
0x1292   :  { %2356 = vmatpush3.msra.mxu1 %v2896_v48 }
0x1293   :  { %2357 = vmatprep.subr.mxu1 %v2573_v2 }
0x1294   :  { %2358 = vmatpush3.msra.mxu1 %v2903_v49 }
0x1295   :  { %2360 = vmatmul.mubr.f32.vlgmr.msra.gmra.mxu1 %v2573_v2  ;;  %2362 = vmatprep.subr.mxu1 %v2573_v2 }
0x1296   :  { %2363 = vmatpush3.msra.mxu1 %v2883_v63  ;;  %2370 = vmatprep.mubr.msk.f32.mxu1 %vm2574_vm2, %v2573_v2 }
0x1297   :  { %2364 = vmatprep.subr.mxu1 %v2573_v2 }
0x1298   :  { %2365 = vmatpush3.msra.mxu1 %v2889_v47 }
0x1299   :  { %2366 = vmatprep.subr.mxu1 %v2573_v2 }
0x129a   :  { %2367 = vmatpush3.msra.mxu1 %v2896_v48 }
0x129b   :  { %2368 = vmatprep.subr.mxu1 %v2573_v2 }
0x129c   :  { %2369 = vmatpush3.msra.mxu1 %v2903_v49 }
0x129d   :  { %2384 = vmatprep.subr.mxu1 %v2573_v2 }
0x134d   :  { %v977_v56 = vpop.f32.mrf.mxu1 }
0x134e   :  { %v978_v20 = vadd.f32 %v2705_v8, %v977_v56 }
0x134f   :  { %v2330_v58 = vpop.f32.mrf.mxu1 }
0x1350   :  { %v981_v7 = vadd.f32 %v978_v20, %v186_v21 }
0x1352   :  { %v2095_v22 = vmul.f32 -1.442695, %v981_v7 }
0x1355   :  { %v1205_v1 = vpop.f32.mrf.mxu1 }
0x1356   :  { %v1206_v4 = vadd.f32 %v2938_v59, %v1205_v1 }
0x1357   :  { %v2361_v5 = vpop.f32.mrf.mxu1 }
0x1358   :  { %1217 = vrot.lane.b32.xlu0 %v1206_v4, %s2575_s12  ;;  %v1209_v12 = vadd.f32 %v1206_v4, %v1090_v11 }
0x135a   :  { %v2106_v14 = vmul.f32 -1.442695, %v1209_v12 }
0x135c   :  { %2497 = vpow2.f32 %v2106_v14 }
0x1369   :  { %v2498_v15 = vpop.eup %2497 }
0x136a   :  { %v1213_v0 = vadd.f32 1.0, %v2498_v15 }
0x136c   :  { %2499 = vrcp.f32 %v1213_v0 }
0x1379   :  { %v2500_v16 = vpop.eup %2499 }
0x137a   :  { %v1227_v60 = vsub.f32 1.0, %v2500_v16  ;;  %v1233_v27 = vmul.f32 0.0, %v2500_v16 }
0x13ca   :  { %v1218_v17 = vpop.permute.xlu0 %1217 }
0x13cb   :  { %v1220_v3 = vmul.f32 %v2500_v16, %v1218_v17 }
0x13cd   :  { %1222 = vrot.lane.b32.xlu1 %v1220_v3, %s2575_s12  ;;  %v1100_v3 = vadd.f32 %v2947_v61, %v1099_v10 }
0x143f   :  { %v1223_v18 = vpop.permute.xlu1 %1222 }
0x1440   :  { %v1225_v19 = vadd.f32 %v1223_v18, %v1090_v11  ;;  %v3000_v11 = vpop.f32.mrf.mxu0 }
0x1442   :  { %2501 = vtanh.f32 %v1225_v19  ;;  %v3002_v12 = vpop.f32.mrf.mxu0 }
0x1443   :  { %2503 = vpow2.f32 %v2095_v22 }
0x144f   :  { %v2502_v6 = vpop.eup %2501 }
0x1450   :  { %1229 = vrot.lane.b32.xlu0 %v2502_v6, %s2576_s3  ;;  %v2504_v23 = vpop.eup %2503 }
0x1451   :  { %v985_v24 = vadd.f32 1.0, %v2504_v23 }
0x1453   :  { %2505 = vrcp.f32 %v985_v24 }
0x1454   :  { %989 = vrot.lane.b32.xlu0 %v978_v20, %s2575_s12 }
0x1460   :  { %v2506_v30 = vpop.eup %2505 }
0x1461   :  { %v999_v35 = vsub.f32 1.0, %v2506_v30  ;;  %v1005_v36 = vmul.f32 %v2506_v30, %v2908_v54 }
0x14c2   :  { %v1230_v25 = vpop.permute.xlu0 %1229 }
0x14c3   :  { %v1232_v28 = vmul.f32 %v1230_v25, %v1227_v60 }
0x14c5   :  { %v2956_v29 = vadd.f32 %v1233_v27, %v1232_v28 }
0x14c6   :  { %v990_v32 = vpop.permute.xlu0 %989 }
0x14c7   :  { %v992_v8 = vmul.f32 %v2506_v30, %v990_v32  ;;  %1236 = vrot.lane.b32.xlu1 %v2956_v29, %s2576_s3 }
0x14c9   :  { %994 = vrot.lane.b32.xlu0 %v992_v8, %s2575_s12 }
0x1539   :  { %v1237_v13 = vpop.permute.xlu1 %1236 }
0x153a   :  { %2371 = vmatmul.mubr.msk.f32.vlgmr.msra.gmra.mxu1 %vm200_vm3, %v1237_v13 }
0x153b   :  { %v995_v62 = vpop.permute.xlu0 %994  ;;  %2385 = vmatpush3.msra.mxu1 %v2883_v63  ;;  %2392 = vmatprep.mubr.msk.f32.mxu1 %vm2574_vm2, %v2573_v2 }
0x153c   :  { %v997_v33 = vadd.f32 %v995_v62, %v186_v21  ;;  %2386 = vmatprep.subr.mxu1 %v2573_v2 }
0x153d   :  { %2387 = vmatpush3.msra.mxu1 %v2889_v47 }
0x153e   :  { %2507 = vtanh.f32 %v997_v33  ;;  %2388 = vmatprep.subr.mxu1 %v2573_v2 }
0x153f   :  { %2389 = vmatpush3.msra.mxu1 %v2896_v48 }
0x1540   :  { %2390 = vmatprep.subr.mxu1 %v2573_v2 }
0x1541   :  { %2391 = vmatpush3.msra.mxu1 %v2903_v49 }
0x1542   :  { %2406 = vmatprep.subr.mxu1 %v2573_v2 }
0x154b   :  { %v2508_v34 = vpop.eup %2507 }
0x154c   :  { %1001 = vrot.lane.b32.xlu0 %v2508_v34, %s2576_s3  ;;  %v1105_v34 = vadd.f32 %v2344_v9, %v2947_v61 }
0x15be   :  { %v1002_v31 = vpop.permute.xlu0 %1001 }
0x15bf   :  { %v1004_v37 = vmul.f32 %v1002_v31, %v999_v35 }
0x15c1   :  { %v1006_v57 = vadd.f32 %v1005_v36, %v1004_v37 }
0x15c3   :  { %1019 = vrot.lane.b32.xlu0 %v1006_v57, %s2576_s3 }
0x15fa   :  { %v1306_v38 = vpop.f32.mrf.mxu1 }
0x15fb   :  { %v1307_v39 = vadd.f32 %v2938_v59, %v1306_v38 }
0x15fc   :  { %v2372_v26 = vpop.f32.mrf.mxu1 }
0x15fd   :  { %1318 = vrot.lane.b32.xlu1 %v1307_v39, %s2575_s12  ;;  %v1310_v42 = vadd.f32 %v1307_v39, %v1095_v41 }
0x15ff   :  { %v2108_v43 = vmul.f32 -1.442695, %v1310_v42 }
0x1601   :  { %2509 = vpow2.f32 %v2108_v43 }
0x160e   :  { %v2510_v44 = vpop.eup %2509 }
0x160f   :  { %v1314_v45 = vadd.f32 1.0, %v2510_v44 }
0x1611   :  { %2511 = vrcp.f32 %v1314_v45 }
0x161e   :  { %v2512_v46 = vpop.eup %2511 }
0x161f   :  { %v1328_v55 = vsub.f32 1.0, %v2512_v46  ;;  %v1334_v58 = vmul.f32 %v2512_v46, %v2956_v29 }
0x1635   :  { %v1020_v40 = vpop.permute.xlu0 %1019 }
0x1636   :  { %2349 = vmatmul.mubr.msk.f32.gmra.mxu0 %vm200_vm3, %v1020_v40 }
0x1637   :  { %2381 = vmatprep.mubr.msk.f32.mxu0 %vm2574_vm2, %v2573_v2 }
0x166f   :  { %v1319_v50 = vpop.permute.xlu1 %1318 }
0x1670   :  { %v1321_v51 = vmul.f32 %v2512_v46, %v1319_v50 }
0x1672   :  { %1323 = vrot.lane.b32.xlu1 %v1321_v51, %s2575_s12 }
0x16e4   :  { %v1324_v52 = vpop.permute.xlu1 %1323 }
0x16e5   :  { %v1326_v53 = vadd.f32 %v1324_v52, %v1095_v41 }
0x16e7   :  { %2513 = vtanh.f32 %v1326_v53 }
0x16f4   :  { %v2514_v54 = vpop.eup %2513 }
0x16f5   :  { %1330 = vrot.lane.b32.xlu1 %v2514_v54, %s2576_s3  ;;  %v1110_v54 = vadd.f32 %v2947_v61, %v3002_v12 }
0x16f6   :  { %v3004_v14 = vpop.f32.mrf.mxu0 }
0x16f8   :  { %v3006_v15 = vpop.f32.mrf.mxu0 }
0x1767   :  { %v1331_v56 = vpop.permute.xlu1 %1330 }
0x1768   :  { %v1333_v1 = vmul.f32 %v1331_v56, %v1328_v55 }
0x176a   :  { %v2985_v4 = vadd.f32 %v1334_v58, %v1333_v1 }
0x176c   :  { %1337 = vrot.lane.b32.xlu1 %v2985_v4, %s2576_s3 }
0x17de   :  { %v1338_v5 = vpop.permute.xlu1 %1337 }
0x17df   :  { %2382 = vmatmul.mubr.msk.f32.vlgmr.msra.gmra.mxu0 %vm200_vm3, %v1338_v5 }
0x17e0   :  { %2396 = vmatpush3.msra.mxu0 %v2883_v63  ;;  %2403 = vmatprep.mubr.msk.f32.mxu0 %vm2574_vm2, %v2573_v2 }
0x17e1   :  { %2397 = vmatprep.subr.mxu0 %v2573_v2 }
0x17e2   :  { %2398 = vmatpush3.msra.mxu0 %v2889_v47 }
0x17e3   :  { %2399 = vmatprep.subr.mxu0 %v2573_v2 }
0x17e4   :  { %2400 = vmatpush3.msra.mxu0 %v2896_v48 }
0x17e5   :  { %2401 = vmatprep.subr.mxu0 %v2573_v2 }
0x17e6   :  { %2402 = vmatpush3.msra.mxu0 %v2903_v49 }
0x17e7   :  { %2417 = vmatprep.subr.mxu0 %v2573_v2 }
0x189f   :  { %v1407_v0 = vpop.f32.mrf.mxu0 }
0x18a0   :  { %v1408_v16 = vadd.f32 %v2938_v59, %v1407_v0 }
0x18a1   :  { %v2383_v17 = vpop.f32.mrf.mxu0 }
0x18a2   :  { %1419 = vrot.lane.b32.xlu0 %v1408_v16, %s2575_s12  ;;  %v1411_v18 = vadd.f32 %v1408_v16, %v1100_v3 }
0x18a4   :  { %v2110_v19 = vmul.f32 -1.442695, %v1411_v18 }
0x18a6   :  { %2515 = vpow2.f32 %v2110_v19 }
0x18b3   :  { %v2516_v6 = vpop.eup %2515 }
0x18b4   :  { %v1415_v20 = vadd.f32 1.0, %v2516_v6 }
0x18b6   :  { %2517 = vrcp.f32 %v1415_v20 }
0x18c3   :  { %v2518_v21 = vpop.eup %2517 }
0x18c4   :  { %v1429_v25 = vsub.f32 1.0, %v2518_v21  ;;  %v1435_v28 = vmul.f32 %v2518_v21, %v2985_v4 }
0x1914   :  { %v1420_v7 = vpop.permute.xlu0 %1419 }
0x1915   :  { %v1422_v22 = vmul.f32 %v2518_v21, %v1420_v7 }
0x1917   :  { %1424 = vrot.lane.b32.xlu1 %v1422_v22, %s2575_s12 }
0x1989   :  { %v1425_v23 = vpop.permute.xlu1 %1424 }
0x198a   :  { %v1427_v24 = vadd.f32 %v1425_v23, %v1100_v3 }
0x198c   :  { %2519 = vtanh.f32 %v1427_v24 }
0x1999   :  { %v2520_v60 = vpop.eup %2519 }
0x199a   :  { %1431 = vrot.lane.b32.xlu0 %v2520_v60, %s2576_s3 }
0x1a0c   :  { %v1432_v27 = vpop.permute.xlu0 %1431 }
0x1a0d   :  { %v1434_v30 = vmul.f32 %v1432_v27, %v1429_v25 }
0x1a0f   :  { %v3014_v32 = vadd.f32 %v1435_v28, %v1434_v30 }
0x1a11   :  { %1438 = vrot.lane.b32.xlu1 %v3014_v32, %s2576_s3 }
0x1a83   :  { %v1439_v8 = vpop.permute.xlu1 %1438 }
0x1a84   :  { %2393 = vmatmul.mubr.msk.f32.vlgmr.msra.gmra.mxu1 %vm200_vm3, %v1439_v8 }
0x1a85   :  { %2407 = vmatpush3.msra.mxu1 %v2883_v63  ;;  %2414 = vmatprep.mubr.msk.f32.mxu1 %vm2574_vm2, %v2573_v2 }
0x1a86   :  { %2408 = vmatprep.subr.mxu1 %v2573_v2 }
0x1a87   :  { %2409 = vmatpush3.msra.mxu1 %v2889_v47 }
0x1a88   :  { %2410 = vmatprep.subr.mxu1 %v2573_v2 }
0x1a89   :  { %2411 = vmatpush3.msra.mxu1 %v2896_v48 }
0x1a8a   :  { %2412 = vmatprep.subr.mxu1 %v2573_v2 }
0x1a8b   :  { %2413 = vmatpush3.msra.mxu1 %v2903_v49 }
0x1a8c   :  { %2428 = vmatprep.subr.mxu1 %v2573_v2 }
0x1b44   :  { %v1508_v13 = vpop.f32.mrf.mxu1 }
0x1b45   :  { %v1509_v62 = vadd.f32 %v2938_v59, %v1508_v13 }
0x1b46   :  { %v2394_v33 = vpop.f32.mrf.mxu1 }
0x1b47   :  { %1520 = vrot.lane.b32.xlu0 %v1509_v62, %s2575_s12  ;;  %v1512_v35 = vadd.f32 %v1509_v62, %v1105_v34 }
0x1b49   :  { %v2112_v31 = vmul.f32 -1.442695, %v1512_v35 }
0x1b4b   :  { %2521 = vpow2.f32 %v2112_v31 }
0x1b58   :  { %v2522_v36 = vpop.eup %2521 }
0x1b59   :  { %v1516_v37 = vadd.f32 1.0, %v2522_v36 }
0x1b5b   :  { %2523 = vrcp.f32 %v1516_v37  ;;  %v1120_v37 = vadd.f32 %v2947_v61, %v3006_v15 }
0x1b68   :  { %v2524_v57 = vpop.eup %2523 }
0x1b69   :  { %v1530_v42 = vsub.f32 1.0, %v2524_v57  ;;  %v1536_v44 = vmul.f32 %v2524_v57, %v3014_v32 }
0x1bb9   :  { %v1521_v38 = vpop.permute.xlu0 %1520 }
0x1bba   :  { %v1523_v39 = vmul.f32 %v2524_v57, %v1521_v38 }
0x1bbc   :  { %1525 = vrot.lane.b32.xlu1 %v1523_v39, %s2575_s12 }
0x1c2e   :  { %v1526_v26 = vpop.permute.xlu1 %1525 }
0x1c2f   :  { %v1528_v40 = vadd.f32 %v1526_v26, %v1105_v34 }
0x1c31   :  { %2525 = vtanh.f32 %v1528_v40 }
0x1c3e   :  { %v2526_v41 = vpop.eup %2525 }
0x1c3f   :  { %1532 = vrot.lane.b32.xlu0 %v2526_v41, %s2576_s3 }
0x1cb1   :  { %v1533_v43 = vpop.permute.xlu0 %1532 }
0x1cb2   :  { %v1535_v45 = vmul.f32 %v1533_v43, %v1530_v42 }
0x1cb4   :  { %v3035_v46 = vadd.f32 %v1536_v44, %v1535_v45 }
0x1cb6   :  { %1539 = vrot.lane.b32.xlu1 %v3035_v46, %s2576_s3 }
0x1d28   :  { %v1540_v50 = vpop.permute.xlu1 %1539 }
0x1d29   :  { %2404 = vmatmul.mubr.msk.f32.vlgmr.msra.gmra.mxu0 %vm200_vm3, %v1540_v50 }
0x1d2a   :  { %2418 = vmatpush3.msra.mxu0 %v2883_v63  ;;  %2425 = vmatprep.mubr.msk.f32.mxu0 %vm2574_vm2, %v2573_v2 }
0x1d2b   :  { %2419 = vmatprep.subr.mxu0 %v2573_v2 }
0x1d2c   :  { %2420 = vmatpush3.msra.mxu0 %v2889_v47 }
0x1d2d   :  { %2421 = vmatprep.subr.mxu0 %v2573_v2 }
0x1d2e   :  { %2422 = vmatpush3.msra.mxu0 %v2896_v48 }
0x1d2f   :  { %2423 = vmatprep.subr.mxu0 %v2573_v2 }
0x1d30   :  { %2424 = vmatpush3.msra.mxu0 %v2903_v49 }
0x1d31   :  { %2439 = vmatprep.subr.mxu0 %v2573_v2 }
0x1de9   :  { %v1609_v51 = vpop.f32.mrf.mxu0 }
0x1dea   :  { %v1610_v52 = vadd.f32 %v2938_v59, %v1609_v51 }
0x1deb   :  { %v2405_v53 = vpop.f32.mrf.mxu0 }
0x1dec   :  { %1621 = vrot.lane.b32.xlu0 %v1610_v52, %s2575_s12  ;;  %v1613_v55 = vadd.f32 %v1610_v52, %v1110_v54 }
0x1dee   :  { %v2114_v56 = vmul.f32 -1.442695, %v1613_v55 }
0x1df0   :  { %2527 = vpow2.f32 %v2114_v56 }
0x1dfd   :  { %v2528_v58 = vpop.eup %2527 }
0x1dfe   :  { %v1617_v1 = vadd.f32 1.0, %v2528_v58 }
0x1e00   :  { %2529 = vrcp.f32 %v1617_v1  ;;  %v1125_v1 = vadd.f32 %v3004_v14, %v2947_v61  ;;  %v1970_v14 = vld [vmem:[%s3139_s9 + $0x8] sm:$0xff] }
0x1e0d   :  { %v2530_v5 = vpop.eup %2529 }
0x1e0e   :  { %v1631_v3 = vsub.f32 1.0, %v2530_v5  ;;  %v1637_v12 = vmul.f32 %v2530_v5, %v3035_v46 }
0x1e5e   :  { %v1622_v9 = vpop.permute.xlu0 %1621 }
0x1e5f   :  { %v1624_v10 = vmul.f32 %v2530_v5, %v1622_v9 }
0x1e61   :  { %1626 = vrot.lane.b32.xlu1 %v1624_v10, %s2575_s12 }
0x1ed3   :  { %v1627_v0 = vpop.permute.xlu1 %1626 }
0x1ed4   :  { %v1629_v16 = vadd.f32 %v1627_v0, %v1110_v54 }
0x1ed6   :  { %2531 = vtanh.f32 %v1629_v16 }
0x1ee3   :  { %v2532_v17 = vpop.eup %2531 }
0x1ee4   :  { %1633 = vrot.lane.b32.xlu0 %v2532_v17, %s2576_s3 }
0x1f56   :  { %v1634_v18 = vpop.permute.xlu0 %1633 }
0x1f57   :  { %v1636_v19 = vmul.f32 %v1634_v18, %v1631_v3 }
0x1f59   :  { %v3057_v6 = vadd.f32 %v1637_v12, %v1636_v19  ;;  %v1969_v19 = vld [vmem:[%s3139_s9] sm:$0xff] }
0x1f5b   :  { %1640 = vrot.lane.b32.xlu1 %v3057_v6, %s2576_s3 }
0x1fcd   :  { %v1641_v20 = vpop.permute.xlu1 %1640 }
0x1fce   :  { %2415 = vmatmul.mubr.msk.f32.vlgmr.msra.gmra.mxu1 %vm200_vm3, %v1641_v20 }
0x1fcf   :  { %2429 = vmatpush3.msra.mxu1 %v2883_v63  ;;  %2436 = vmatprep.mubr.msk.f32.mxu1 %vm2574_vm2, %v2573_v2  ;;  %v1115_v63 = vadd.f32 %v3000_v11, %v2947_v61  ;;  %v1971_v61 = vld [vmem:[%s3139_s9 + $0x10] sm:$0xff] }
0x1fd0   :  { %2430 = vmatprep.subr.mxu1 %v2573_v2 }
0x1fd1   :  { %2431 = vmatpush3.msra.mxu1 %v2889_v47 }
0x1fd2   :  { %2432 = vmatprep.subr.mxu1 %v2573_v2 }
0x1fd3   :  { %2433 = vmatpush3.msra.mxu1 %v2896_v48 }
0x1fd4   :  { %2434 = vmatprep.subr.mxu1 %v2573_v2 }
0x1fd5   :  { %2435 = vmatpush3.msra.mxu1 %v2903_v49 }
0x208e   :  { %v1710_v21 = vpop.f32.mrf.mxu1 }
0x208f   :  { %v1711_v7 = vadd.f32 %v2938_v59, %v1710_v21  ;;  %v1944_v21 = vrot.slane %v2985_v4, 6 }
0x2090   :  { %v2416_v22 = vpop.f32.mrf.mxu1 }
0x2091   :  { %1722 = vrot.lane.b32.xlu0 %v1711_v7, %s2575_s12  ;;  %v1714_v23 = vadd.f32 %v1711_v7, %v1115_v63  ;;  %v1946_v7 = vrot.slane %v3014_v32, 5  ;;  %v1942_v22 = vrot.slane %v2956_v29, 7 }
0x2093   :  { %v2116_v24 = vmul.f32 -1.442695, %v1714_v23  ;;  %v1950_v23 = vrot.slane %v3057_v6, 3 }
0x2095   :  { %2533 = vpow2.f32 %v2116_v24  ;;  %v1957_v24 = vsel %vm1956_vm4, %v1942_v22, %v1944_v21 }
0x20a2   :  { %v2534_v47 = vpop.eup %2533 }
0x20a3   :  { %v1718_v60 = vadd.f32 1.0, %v2534_v47 }
0x20a5   :  { %2535 = vrcp.f32 %v1718_v60  ;;  %v1959_v60 = vsel %vm1958_vm5, %v1957_v24, %v1946_v7 }
0x20b2   :  { %v2536_v48 = vpop.eup %2535 }
0x20b3   :  { %v1732_v8 = vsub.f32 1.0, %v2536_v48  ;;  %v1738_v11 = vmul.f32 %v2536_v48, %v3057_v6 }
0x2103   :  { %v1723_v25 = vpop.permute.xlu0 %1722 }
0x2104   :  { %v1725_v27 = vmul.f32 %v2536_v48, %v1723_v25 }
0x2106   :  { %1727 = vrot.lane.b32.xlu1 %v1725_v27, %s2575_s12 }
0x2178   :  { %v1728_v49 = vpop.permute.xlu1 %1727 }
0x2179   :  { %v1730_v28 = vadd.f32 %v1728_v49, %v1115_v63  ;;  %v1948_v63 = vrot.slane %v3035_v46, 4 }
0x217b   :  { %2537 = vtanh.f32 %v1730_v28  ;;  %v1961_v49 = vsel %vm1960_vm6, %v1959_v60, %v1948_v63 }
0x217c   :  { %v1962_v29 = vsel %vm80_vm0, %v1961_v49, %v1950_v23 }
0x2188   :  { %v2538_v30 = vpop.eup %2537 }
0x2189   :  { %1734 = vrot.lane.b32.xlu0 %v2538_v30, %s2576_s3 }
0x21fb   :  { %v1735_v13 = vpop.permute.xlu0 %1734 }
0x21fc   :  { %v1737_v62 = vmul.f32 %v1735_v13, %v1732_v8  ;;  %v2121_v8 = vld [vmem:[%s3140_s10] ss:$0 sm:$0xff] }
0x21fe   :  { %v3078_v33 = vadd.f32 %v1738_v11, %v1737_v62 }
0x2200   :  { %1741 = vrot.lane.b32.xlu1 %v3078_v33, %s2576_s3 }
0x2272   :  { %v1742_v34 = vpop.permute.xlu1 %1741 }
0x2273   :  { %2426 = vmatmul.mubr.msk.f32.vlgmr.msra.gmra.mxu0 %vm200_vm3, %v1742_v34 }
0x2274   :  { %2447 = vmatprep.mubr.msk.f32.mxu0 %vm2574_vm2, %v2573_v2 }
0x2333   :  { %v1811_v35 = vpop.f32.mrf.mxu0 }
0x2334   :  { %v1812_v31 = vadd.f32 %v2938_v59, %v1811_v35 }
0x2335   :  { %v2427_v36 = vpop.f32.mrf.mxu0 }
0x2336   :  { %1823 = vrot.lane.b32.xlu0 %v1812_v31, %s2575_s12  ;;  %v1815_v57 = vadd.f32 %v1812_v31, %v1120_v37 }
0x2338   :  { %v2118_v38 = vmul.f32 -1.442695, %v1815_v57 }
0x233a   :  { %2539 = vpow2.f32 %v2118_v38 }
0x2347   :  { %v2540_v39 = vpop.eup %2539 }
0x2348   :  { %v1819_v26 = vadd.f32 1.0, %v2540_v39 }
0x234a   :  { %2541 = vrcp.f32 %v1819_v26 }
0x2357   :  { %v2542_v40 = vpop.eup %2541 }
0x2358   :  { %v1833_v50 = vsub.f32 1.0, %v2542_v40  ;;  %v1839_v15 = vmul.f32 %v2542_v40, %v3078_v33 }
0x23a8   :  { %v1824_v41 = vpop.permute.xlu0 %1823 }
0x23a9   :  { %v1826_v42 = vmul.f32 %v2542_v40, %v1824_v41 }
0x23ab   :  { %1828 = vrot.lane.b32.xlu1 %v1826_v42, %s2575_s12 }
0x241d   :  { %v1829_v43 = vpop.permute.xlu1 %1828 }
0x241e   :  { %v1831_v44 = vadd.f32 %v1829_v43, %v1120_v37 }
0x2420   :  { %2543 = vtanh.f32 %v1831_v44 }
0x242d   :  { %v2544_v45 = vpop.eup %2543 }
0x242e   :  { %1835 = vrot.lane.b32.xlu0 %v2544_v45, %s2576_s3 }
0x24a0   :  { %v1836_v51 = vpop.permute.xlu0 %1835 }
0x24a1   :  { %v1838_v52 = vmul.f32 %v1836_v51, %v1833_v50 }
0x24a3   :  { %v1840_v53 = vadd.f32 %v1839_v15, %v1838_v52 }
0x24a5   :  { %1842 = vrot.lane.b32.xlu1 %v1840_v53, %s2576_s3  ;;  %v1954_v48 = vrot.slane %v1840_v53, 1 }
0x2517   :  { %v1843_v54 = vpop.permute.xlu1 %1842 }
0x2518   :  { %2437 = vmatmul.mubr.msk.f32.vlgmr.msra.gmra.mxu1 %vm200_vm3, %v1843_v54 }
0x25d8   :  { %v1912_v55 = vpop.f32.mrf.mxu1 }
0x25d9   :  { %v1913_v56 = vadd.f32 %v2938_v59, %v1912_v55  ;;  %v1972_v59 = vld [vmem:[%s3139_s9 + $0x18] sm:$0xff] }
0x25da   :  { %v2438_v58 = vpop.f32.mrf.mxu1  ;;  %2440 = vmatpush3.msra.mxu0 %v1972_v59 }
0x25db   :  { %1924 = vrot.lane.b32.xlu0 %v1913_v56, %s2575_s12  ;;  %v1916_v5 = vadd.f32 %v1913_v56, %v1125_v1  ;;  %2441 = vmatprep.subr.mxu0 %v2573_v2 }
0x25dc   :  { %2442 = vmatpush3.msra.mxu0 %v1971_v61 }
0x25dd   :  { %v2120_v9 = vmul.f32 -1.442695, %v1916_v5  ;;  %2443 = vmatprep.subr.mxu0 %v2573_v2 }
0x25de   :  { %2444 = vmatpush3.msra.mxu0 %v1970_v14 }
0x25df   :  { %2545 = vpow2.f32 %v2120_v9  ;;  %2445 = vmatprep.subr.mxu0 %v2573_v2  ;;  %v1952_v2 = vrot.slane %v3078_v33, 2 }
0x25e0   :  { %2446 = vmatpush3.msra.mxu0 %v1969_v19 }
0x25e1   :  { %v1964_v46 = vsel %vm1963_vm7, %v1962_v29, %v1952_v2 }
0x25e2   :  { %v1966_v28 = vsel %vm1965_vm8, %v1964_v46, %v1954_v48 }
0x25ec   :  { %v2546_v10 = vpop.eup %2545 }
0x25ed   :  { %v1920_v0 = vadd.f32 1.0, %v2546_v10 }
0x25ef   :  { %2547 = vrcp.f32 %v1920_v0 }
0x25fc   :  { %v2548_v16 = vpop.eup %2547 }
0x25fd   :  { %v1934_v47 = vsub.f32 1.0, %v2548_v16  ;;  %v1940_v4 = vmul.f32 %v2548_v16, %v1840_v53 }
0x264d   :  { %v1925_v17 = vpop.permute.xlu0 %1924 }
0x264e   :  { %v1927_v3 = vmul.f32 %v2548_v16, %v1925_v17 }
0x2650   :  { %1929 = vrot.lane.b32.xlu1 %v1927_v3, %s2575_s12 }
0x26c2   :  { %v1930_v18 = vpop.permute.xlu1 %1929 }
0x26c3   :  { %v1932_v12 = vadd.f32 %v1930_v18, %v1125_v1 }
0x26c5   :  { %2549 = vtanh.f32 %v1932_v12 }
0x26d2   :  { %v2550_v20 = vpop.eup %2549 }
0x26d3   :  { %1936 = vrot.lane.b32.xlu0 %v2550_v20, %s2576_s3 }
0x2745   :  { %v1937_v25 = vpop.permute.xlu0 %1936 }
0x2746   :  { %v1939_v27 = vmul.f32 %v1937_v25, %v1934_v47 }
0x2748   :  { %v1941_v32 = vadd.f32 %v1940_v4, %v1939_v27 }
0x274a   :  { %v1968_v6 = vsel %vm1967_vm9, %v1966_v28, %v1941_v32 }
0x274b   :  { %1981 = vrot.lane.b32.xlu1 %v1968_v6, %s2576_s3 }
0x27bd   :  { %v1982_v30 = vpop.permute.xlu1 %1981 }
0x27be   :  { %2448 = vmatmul.mubr.msk.f32.vlgmr.msra.gmra.mxu0 %vm200_vm3, %v1982_v30 }
0x287e   :  { %v2051_v13 = vpop.f32.mrf.mxu0 }
0x287f   :  { %v2052_v11 = vadd.f32 %v2121_v8, %v2051_v13 }
0x2880   :  { %v2449_v62 = vpop.f32.mrf.mxu0 }
0x2881   :  { %2055 = vst [vmem:[#allocation2] sm:$0xff] %v2052_v11 }
0x2882   :  { %2562 = shalt.err (!%p2559_p4)
}
0x2883   :  { %2065 = dma.vmem_to_hbm [thread:$0]  %s2063_s27, 128, %s3141_s11, [#allocation3]  }
0x2884   :  { %2571 = dma.done.wait [#allocation3], 128  }
0x2885   :  { %2572 = vsyncadd [#allocation3], 4294967168 }
0x2886   :  { %2069 = vsyncpa [#allocation3], 1 }

</bundles_post_ra>
